<compile_context>
chip_gen: v7x
topology: tpu7x:2x2x1
jax: 0.10.0
libtpu: 0.0.40
codegen_flags: <defaults>
</compile_context>

<pallas_src>
import functools

import jax
import jax.numpy as jnp
from jax.experimental import pallas as pl
from jax.experimental.pallas import tpu as pltpu

_LANES = 128
_SUBLANES = 8
_MIN_PALLAS_ELEMS = 64 * 1024  # below this, XLA's fused reduce is faster


def _tpu_generation():
    """Best-effort TPU generation (5/6/7); 0 if unknown (always safe)."""
    try:
        kind = jax.devices()[0].device_kind.lower()
    except Exception:  # pragma: no cover - non-TPU / odd backends
        return 0
    for g in (7, 6, 5):
        if f"v{g}" in kind:
            return g
    return 0


def _abs_sum_kernel(x_ref, o_ref, *, total_rows, block_rows, steps_per_chunk,
                    first_masked_block, needs_mask):
    c = pl.program_id(0)   # parallel chunk axis (TensorCore sharding on v7x)
    i = pl.program_id(1)   # sequential reduction axis within a chunk

    @pl.when(i == 0)
    def _():
        o_ref[...] = jnp.zeros_like(o_ref)

    # Native-dtype read; abs is a sign-bit clear so do it before the f32 cast
    # (halves abs vreg count for bf16 inputs; identical for f32).
    x_native = x_ref[...]

    def _accum(x_f32):
        # Vector partial accumulate: vreg-to-vreg adds only (pure VPU, hides
        # under the streaming DMA).  Cross-lane/sublane reduce is deferred to
        # the wrapper's tiny jnp.sum over the (num_chunks, 8, 128) partials.
        o_ref[...] += x_f32.reshape(-1, _SUBLANES, _LANES).sum(axis=0)[None]

    if not needs_mask:
        # The grid tiles the array exactly: no masking code emitted at all.
        _accum(jnp.abs(x_native).astype(jnp.float32))
    else:
        # UNCLAMPED block index; for the overrun block(s) of the last chunk it
        # is >= the true extent, so every row masks to zero even though the
        # DMA (via the clamped index_map) re-read the last valid block.
        block_idx = c * steps_per_chunk + i
        is_clean = block_idx < first_masked_block

        @pl.when(is_clean)
        def _():
            # Fast path: full, in-range block.  No iota/compare/select.
            _accum(jnp.abs(x_native).astype(jnp.float32))

        @pl.when(jnp.logical_not(is_clean))
        def _():
            # Slow path: partial tail block or overrun block (at most 1-2 per
            # chunk).  Select-mask BEFORE any arithmetic so stale/garbage VMEM
            # rows (possibly NaN/Inf bit patterns) never reach the sum.
            row0 = block_idx * block_rows
            row_ids = row0 + jax.lax.broadcasted_iota(
                jnp.int32, (block_rows, _LANES), 0)
            x = jnp.where(row_ids < total_rows,
                          x_native.astype(jnp.float32), 0.0)
            _accum(jnp.abs(x))


def deformation_prior_loss(delta_dk, *, block_rows=None, min_pallas_elems=None):
    """loss = mean(|delta_dk|) over all elements, accumulated in float32."""
    n_true = delta_dk.size
    if n_true == 0:
        return jnp.float32(jnp.nan)  # matches torch mean of an empty tensor

    gen = _tpu_generation()
    if min_pallas_elems is None:
        # On v7x fixed kernel-prime overhead dominates to larger sizes.
        min_pallas_elems = _MIN_PALLAS_ELEMS * (4 if gen >= 7 else 1)

    total_rows_est = (n_true + _LANES - 1) // _LANES
    if n_true < min_pallas_elems or total_rows_est < 16:
        # Launch + pipeline-prime overhead dwarfs the work at this size.
        return jnp.mean(jnp.abs(delta_dk.astype(jnp.float32)))

    flat = jnp.ravel(delta_dk)        # free reshape; keep native dtype in HBM
    rem = n_true % _LANES
    if rem:
        # Pad only when not lane-aligned (zeros are sum-neutral); lane-aligned
        # inputs incur no extra HBM copy.
        flat = jnp.pad(flat, (0, _LANES - rem))
    total_rows = flat.size // _LANES
    x2d = flat.reshape(total_rows, _LANES)

    if block_rows is None:
        # Size the block by BYTES of native-dtype data (dtype-aware rows keep
        # per-step HBM bytes constant for bf16 vs f32):
        #   * v6e/v7x: 8 MiB  -> 16 MiB double-buffered, fits 32 MiB default
        #              scoped VMEM with headroom.
        #   * v5e / unknown: 4 MiB -> 8 MiB double-buffered, fits v5e's 16 MiB
        #              default scoped VMEM (no vmem_limit override needed).
        target_bytes = (8 << 20) if gen >= 6 else (4 << 20)
        itemsize = jnp.dtype(delta_dk.dtype).itemsize
        block_rows = max(16, target_bytes // (_LANES * itemsize))

    # Rows: multiple of 16 so the (sublane, lane) tiling constraint holds for
    # both f32 and bf16, and never larger than the array.
    block_rows = max(16, (block_rows // 16) * 16)
    eff_rows = min(block_rows, (total_rows // 16) * 16)
    steps_total = pl.cdiv(total_rows, eff_rows)
    num_chunks = 2 if steps_total >= 2 else 1
    steps_per_chunk = pl.cdiv(steps_total, num_chunks)
    needs_mask = (num_chunks * steps_per_chunk * eff_rows) != total_rows
    # First block index that needs row-masking: the partial last block (if the
    # block size does not divide total_rows) and every overrun block after it.
    first_masked_block = steps_total - (1 if (total_rows % eff_rows) else 0)

    def in_index_map(c, i):
        # Clamp so a chunk that runs past the end re-reads (and fully masks)
        # the last valid block instead of issuing an out-of-bounds DMA.
        return (jnp.minimum(c * steps_per_chunk + i, steps_total - 1), 0)

    kernel = functools.partial(
        _abs_sum_kernel,
        total_rows=total_rows,
        block_rows=eff_rows,
        steps_per_chunk=steps_per_chunk,
        first_masked_block=first_masked_block,
        needs_mask=needs_mask,
    )

    partials = pl.pallas_call(
        kernel,
        out_shape=jax.ShapeDtypeStruct((num_chunks, _SUBLANES, _LANES),
                                       jnp.float32),
        grid_spec=pltpu.PrefetchScalarGridSpec(
            num_scalar_prefetch=0,
            grid=(num_chunks, steps_per_chunk),
            in_specs=[pl.BlockSpec((eff_rows, _LANES), in_index_map)],
            out_specs=pl.BlockSpec((1, _SUBLANES, _LANES),
                                   lambda c, i: (c, 0, 0)),
        ),
        compiler_params=pltpu.CompilerParams(
            dimension_semantics=("parallel", "arbitrary"),
        ),
    )(x2d)

    # Final tiny cross-lane reduce + normalization by the TRUE element count.
    return jnp.sum(partials) / jnp.float32(n_true)


if __name__ == "__main__":
    key = jax.random.PRNGKey(0)
    k1, k2, k3, k4 = jax.random.split(key, 4)

    # 1) Realistic keypoint-delta shape (B=2, num_kp=10, 3): short-circuit path.
    x_small = jax.random.normal(k1, (2, 10, 3), dtype=jnp.float32)
    # 2) Larger lane-aligned f32 tensor: Pallas path, single unmasked block
    #    with the default (byte-sized) block.
    x_big = jax.random.normal(k2, (8, 320, 256), dtype=jnp.float32)
    # 3) f32 with a FORCED small block so steps_total is odd: exercises the
    #    pl.when-gated masked path for both the partial tail block and the
    #    clamped overrun block of the last chunk.
    x_odd = jax.random.normal(k3, (700, 128), dtype=jnp.float32)
    # 4) bf16 with a non-lane-aligned element count: native-dtype read,
    #    in-kernel bf16 abs + f32 cast, pad fallback, masked tail block.
    x_bf16 = jax.random.normal(k4, (5, 121, 121),
                               dtype=jnp.float32).astype(jnp.bfloat16)

    tests = (
        (x_small, {}, 1e-6),
        (x_big, {"min_pallas_elems": 1024}, 1e-5),
        (x_odd, {"block_rows": 256, "min_pallas_elems": 1024}, 1e-5),
        (x_bf16, {"min_pallas_elems": 1024}, 1e-4),
    )
    for x, kwargs, tol in tests:
        out = jax.block_until_ready(deformation_prior_loss(x, **kwargs))
        ref = jnp.mean(jnp.abs(x.astype(jnp.float32)))
        assert jnp.allclose(out, ref, rtol=tol, atol=1e-6), (x.shape, out, ref)

    print("KERNEL_OK")
</pallas_src>

<mosaic_0001>
module attributes {stable_mosaic.version = 11 : i64} {
  func.func @_abs_sum_kernel(%arg0: i32, %arg1: i32, %arg2: memref<5120x128xf32, #tpu.memory_space<vmem>>, %arg3: memref<1x8x128xf32, #tpu.memory_space<vmem>>) attributes {dimension_semantics = [#tpu.dimension_semantics<parallel>, #tpu.dimension_semantics<arbitrary>], iteration_bounds = array<i64: 1, 1>, scalar_prefetch = 0 : i64, scratch_operands = 0 : i64, tpu.core_type = #tpu.core_type<tc>, window_params = [{transform_indices = @transform_0, window_bounds = array<i64: 5120, 128>}, {transform_indices = @transform_1, window_bounds = array<i64: 1, 8, 128>}]} {
    %c0_i32 = arith.constant 0 : i32
    %0 = arith.cmpi eq, %arg1, %c0_i32 : i32
    %1 = arith.extui %0 : i1 to i32
    %c0_i32_0 = arith.constant 0 : i32
    %2 = arith.cmpi ne, %1, %c0_i32_0 : i32
    scf.if %2 {
      %cst_8 = arith.constant 0.000000e+00 : f32
      %11 = vector.broadcast %cst_8 : f32 to vector<1x8x128xf32>
      %c0_9 = arith.constant 0 : index
      %c0_10 = arith.constant 0 : index
      %c0_11 = arith.constant 0 : index
      %12 = vector.load %arg3[%c0_9, %c0_10, %c0_11] : memref<1x8x128xf32, #tpu.memory_space<vmem>>, vector<1x8x128xf32>
      tpu.vector_store %arg3[%c0_9, %c0_10, %c0_11], %11 {strides = array<i32>} : memref<1x8x128xf32, #tpu.memory_space<vmem>>, vector<1x8x128xf32>,
    } else {
    }
    %c0 = arith.constant 0 : index
    %c0_1 = arith.constant 0 : index
    %3 = vector.load %arg2[%c0, %c0_1] : memref<5120x128xf32, #tpu.memory_space<vmem>>, vector<5120x128xf32>
    %4 = math.absf %3 : vector<5120x128xf32>
    %c0_2 = arith.constant 0 : index
    %c0_3 = arith.constant 0 : index
    %c0_4 = arith.constant 0 : index
    %5 = vector.load %arg3[%c0_2, %c0_3, %c0_4] : memref<1x8x128xf32, #tpu.memory_space<vmem>>, vector<1x8x128xf32>
    %6 = vector.shape_cast %4 : vector<5120x128xf32> to vector<640x8x128xf32>
    %cst = arith.constant dense<0.000000e+00> : vector<8x128xf32>
    %7 = vector.multi_reduction <add>, %6, %cst [0] : vector<640x8x128xf32> to vector<8x128xf32>
    %8 = vector.shape_cast %7 : vector<8x128xf32> to vector<1x8x128xf32>
    %9 = arith.addf %5, %8 : vector<1x8x128xf32>
    %c0_5 = arith.constant 0 : index
    %c0_6 = arith.constant 0 : index
    %c0_7 = arith.constant 0 : index
    %10 = vector.load %arg3[%c0_5, %c0_6, %c0_7] : memref<1x8x128xf32, #tpu.memory_space<vmem>>, vector<1x8x128xf32>
    tpu.vector_store %arg3[%c0_5, %c0_6, %c0_7], %9 {strides = array<i32>} : memref<1x8x128xf32, #tpu.memory_space<vmem>>, vector<1x8x128xf32>,
    return
  }
  func.func @transform_0(%arg0: i32, %arg1: i32) -> (i32, i32) {
    %c1_i32 = arith.constant 1 : i32
    %0 = arith.muli %arg0, %c1_i32 : i32
    %1 = arith.addi %0, %arg1 : i32
    %c0_i32 = arith.constant 0 : i32
    %2 = arith.minsi %1, %c0_i32 : i32
    %c0_i32_0 = arith.constant 0 : i32
    %c0_i32_1 = arith.constant 0 : i32
    return %2, %c0_i32_0 : i32, i32
  }
  func.func @transform_1(%arg0: i32, %arg1: i32) -> (i32, i32, i32) {
    %c0_i32 = arith.constant 0 : i32
    %c0_i32_0 = arith.constant 0 : i32
    %c0_i32_1 = arith.constant 0 : i32
    return %arg0, %c0_i32, %c0_i32_0 : i32, i32, i32
  }
}

</mosaic_0001>

<bundles_post_ra>
// kernel: tpu_custom_call.1
= control target key start
LH: loop header
LB: loop body
LE: loop exit
PB: predicated region body
PF: predicated region fallthrough
CT: control target
= control target key end

     0   :  { %6 = vsyncpa [#allocation3], 0  ;;  %s2068_s0 = inlined_call_operand.hbm [shape: f32[5120,128], index: 0, kind: input, shape index: {}]   ;;  %s2069_s1 = inlined_call_operand.hbm [shape: f32[1,8,128], index: 1, kind: output, shape index: {}]  }
   0x1   :  { %7 = vsyncpa [#allocation4], 0  ;;  %s2030_s6 = smov [#allocation2]   ;;  %s1982_s10 = scalar_lea.hbm %s2068_s0, 81920 }
   0x2   :  { %s19_s7 = sshll.u32 %s2030_s6, 4  ;;  %p1983_p0 = scmp.ne.s32.totalorder %s2068_s0, %s1982_s10  ;;  %s20_s7 = int_to_ptr.vmem [resolvable:$true] %s19_s7 }
   0x3   :  { %p1986_p1 = scmp.lt.u32.totalorder %s1982_s10, %s2068_s0 }
   0x5   :  { %p1988_p2 = pnand %p1986_p1, %p1983_p0 }
   0x7   :  { %1991 = shalt.err (!%p1988_p2)
}
   0x8   :  { %s1992_s15 = scalar_lea.vmem %s20_s7, 81920  ;;  %p1997_p4 = scmp.lt.s32.totalorder %s20_s7, %s20_s7 }
   0x9   :  { %p1993_p3 = scmp.ne.s32.totalorder %s20_s7, %s1992_s15  ;;  %p1998_p5 = scmp.lt.s32.totalorder %s1992_s15, %s1992_s15 }
   0xb   :  { %p1999_p6 = por %p1998_p5, %p1997_p4 }
   0xd   :  { %p2000_p7 = pnand %p1999_p6, %p1993_p3 }
   0xf   :  { %2003 = shalt.err (!%p2000_p7)
}
  0x10   :  { %s2031_s16 = smov 128   ;;  %s2032_s17 = smov 8  }
  0x11   :  { %25 = dma.hbm_to_vmem [thread:$0]  %s2068_s0, 81920, %s20_s7, [#allocation3], %s2031_s16, %s2031_s16, %s2032_s17  }
  0x12   :  { %2026 = dma.done.wait [#allocation3], 81920  }
  0x13   :  { %2027 = vsyncadd [#allocation3], 4294885376  ;;  %v38_v0 = vld [vmem:[#allocation2] sm:$0xff]  ;;  %v39_v1 = vld [vmem:[#allocation2 + $0x8] sm:$0xff]  ;;  %s2033_s0 = smov [#allocation5]  }
  0x14   :  { %v40_v2 = vld [vmem:[#allocation2 + $0x10] sm:$0xff]  ;;  %v41_v3 = vld [vmem:[#allocation2 + $0x18] sm:$0xff]  ;;  %v678_v4 = vand.u32 2147483647, %v38_v0  ;;  %v679_v5 = vand.u32 2147483647, %v39_v1 }
  0x15   :  { %v42_v6 = vld [vmem:[#allocation2 + $0x20] sm:$0xff]  ;;  %v680_v7 = vand.u32 2147483647, %v40_v2  ;;  %v681_v8 = vand.u32 2147483647, %v41_v3  ;;  %v43_v10 = vld [vmem:[#allocation2 + $0x28] sm:$0xff] }
  0x16   :  { %v1319_v9 = vadd.f32 %v679_v5, %v678_v4  ;;  %v682_v11 = vand.u32 2147483647, %v42_v6  ;;  %v44_v13 = vld [vmem:[#allocation2 + $0x30] sm:$0xff]  ;;  %v683_v14 = vand.u32 2147483647, %v43_v10  ;;  %v45_v16 = vld [vmem:[#allocation2 + $0x38] sm:$0xff] }
  0x17   :  { %v684_v17 = vand.u32 2147483647, %v44_v13  ;;  %v46_v19 = vld [vmem:[#allocation2 + $0x40] sm:$0xff]  ;;  %v685_v20 = vand.u32 2147483647, %v45_v16  ;;  %v47_v22 = vld [vmem:[#allocation2 + $0x48] sm:$0xff] }
  0x18   :  { %v1320_v12 = vadd.f32 %v1319_v9, %v680_v7  ;;  %v686_v23 = vand.u32 2147483647, %v46_v19  ;;  %v48_v25 = vld [vmem:[#allocation2 + $0x50] sm:$0xff]  ;;  %v687_v26 = vand.u32 2147483647, %v47_v22  ;;  %v49_v28 = vld [vmem:[#allocation2 + $0x58] sm:$0xff] }
  0x19   :  { %v688_v29 = vand.u32 2147483647, %v48_v25  ;;  %v50_v31 = vld [vmem:[#allocation2 + $0x60] sm:$0xff]  ;;  %v689_v32 = vand.u32 2147483647, %v49_v28  ;;  %v51_v34 = vld [vmem:[#allocation2 + $0x68] sm:$0xff] }
  0x1a   :  { %v1321_v15 = vadd.f32 %v1320_v12, %v681_v8  ;;  %v690_v35 = vand.u32 2147483647, %v50_v31  ;;  %v52_v37 = vld [vmem:[#allocation2 + $0x70] sm:$0xff]  ;;  %v691_v38 = vand.u32 2147483647, %v51_v34  ;;  %v53_v40 = vld [vmem:[#allocation2 + $0x78] sm:$0xff] }
  0x1b   :  { %v692_v41 = vand.u32 2147483647, %v52_v37  ;;  %v54_v43 = vld [vmem:[#allocation2 + $0x80] sm:$0xff]  ;;  %v693_v44 = vand.u32 2147483647, %v53_v40  ;;  %v55_v46 = vld [vmem:[#allocation2 + $0x88] sm:$0xff] }
  0x1c   :  { %v1322_v18 = vadd.f32 %v1321_v15, %v682_v11  ;;  %v694_v47 = vand.u32 2147483647, %v54_v43  ;;  %v56_v49 = vld [vmem:[#allocation2 + $0x90] sm:$0xff]  ;;  %v695_v50 = vand.u32 2147483647, %v55_v46  ;;  %v57_v52 = vld [vmem:[#allocation2 + $0x98] sm:$0xff] }
  0x1d   :  { %v696_v53 = vand.u32 2147483647, %v56_v49  ;;  %v58_v55 = vld [vmem:[#allocation2 + $0xa0] sm:$0xff]  ;;  %v697_v56 = vand.u32 2147483647, %v57_v52  ;;  %v59_v58 = vld [vmem:[#allocation2 + $0xa8] sm:$0xff] }
  0x1e   :  { %v1323_v21 = vadd.f32 %v1322_v18, %v683_v14  ;;  %v698_v59 = vand.u32 2147483647, %v58_v55  ;;  %v60_v61 = vld [vmem:[#allocation2 + $0xb0] sm:$0xff]  ;;  %v699_v62 = vand.u32 2147483647, %v59_v58  ;;  %v61_v0 = vld [vmem:[#allocation2 + $0xb8] sm:$0xff] }
  0x1f   :  { %v700_v1 = vand.u32 2147483647, %v60_v61  ;;  %v62_v3 = vld [vmem:[#allocation2 + $0xc0] sm:$0xff]  ;;  %v701_v4 = vand.u32 2147483647, %v61_v0  ;;  %v63_v6 = vld [vmem:[#allocation2 + $0xc8] sm:$0xff] }
  0x20   :  { %v1324_v24 = vadd.f32 %v1323_v21, %v684_v17  ;;  %v702_v7 = vand.u32 2147483647, %v62_v3  ;;  %v64_v9 = vld [vmem:[#allocation2 + $0xd0] sm:$0xff]  ;;  %v703_v10 = vand.u32 2147483647, %v63_v6  ;;  %v65_v12 = vld [vmem:[#allocation2 + $0xd8] sm:$0xff] }
  0x21   :  { %v704_v13 = vand.u32 2147483647, %v64_v9  ;;  %v66_v15 = vld [vmem:[#allocation2 + $0xe0] sm:$0xff]  ;;  %v705_v16 = vand.u32 2147483647, %v65_v12  ;;  %v67_v18 = vld [vmem:[#allocation2 + $0xe8] sm:$0xff] }
  0x22   :  { %v1325_v27 = vadd.f32 %v1324_v24, %v685_v20  ;;  %v706_v19 = vand.u32 2147483647, %v66_v15  ;;  %v68_v21 = vld [vmem:[#allocation2 + $0xf0] sm:$0xff]  ;;  %v707_v22 = vand.u32 2147483647, %v67_v18  ;;  %v69_v24 = vld [vmem:[#allocation2 + $0xf8] sm:$0xff] }
  0x23   :  { %v708_v25 = vand.u32 2147483647, %v68_v21  ;;  %v709_v28 = vand.u32 2147483647, %v69_v24  ;;  %s1966_s20 = sshll.u32 %s2033_s0, 4  ;;  %s1967_s20 = int_to_ptr.vmem [resolvable:$true] %s1966_s20 }
  0x24   :  { %v1326_v30 = vadd.f32 %v1325_v27, %v686_v23  ;;  %v70_v27 = vld [vmem:[#allocation2 + $0x100] sm:$0xff]  ;;  %s2004_s21 = scalar_lea.vmem %s1967_s20, 128  ;;  %p2009_p9 = scmp.lt.s32.totalorder %s1967_s20, %s1967_s20 }
  0x25   :  { %v710_v31 = vand.u32 2147483647, %v70_v27  ;;  %p2005_p8 = scmp.ne.s32.totalorder %s1967_s20, %s2004_s21  ;;  %p2010_p10 = scmp.lt.s32.totalorder %s2004_s21, %s2004_s21 }
  0x26   :  { %v1327_v33 = vadd.f32 %v1326_v30, %v687_v26  ;;  %v71_v30 = vld [vmem:[#allocation2 + $0x108] sm:$0xff] }
  0x27   :  { %v711_v34 = vand.u32 2147483647, %v71_v30  ;;  %p2011_p11 = por %p2010_p10, %p2009_p9 }
  0x28   :  { %v1328_v36 = vadd.f32 %v1327_v33, %v688_v29  ;;  %v72_v33 = vld [vmem:[#allocation2 + $0x110] sm:$0xff] }
  0x29   :  { %v712_v37 = vand.u32 2147483647, %v72_v33  ;;  %p2012_p12 = pnand %p2011_p11, %p2005_p8 }
  0x2a   :  { %v1329_v39 = vadd.f32 %v1328_v36, %v689_v32  ;;  %v73_v36 = vld [vmem:[#allocation2 + $0x118] sm:$0xff] }
  0x2b   :  { %v713_v40 = vand.u32 2147483647, %v73_v36 }
  0x2c   :  { %v1330_v42 = vadd.f32 %v1329_v39, %v690_v35  ;;  %v74_v39 = vld [vmem:[#allocation2 + $0x120] sm:$0xff] }
  0x2d   :  { %v714_v43 = vand.u32 2147483647, %v74_v39 }
  0x2e   :  { %v1331_v45 = vadd.f32 %v1330_v42, %v691_v38  ;;  %v75_v42 = vld [vmem:[#allocation2 + $0x128] sm:$0xff] }
  0x2f   :  { %v715_v46 = vand.u32 2147483647, %v75_v42 }
  0x30   :  { %v1332_v48 = vadd.f32 %v1331_v45, %v692_v41  ;;  %v76_v45 = vld [vmem:[#allocation2 + $0x130] sm:$0xff] }
  0x31   :  { %v716_v49 = vand.u32 2147483647, %v76_v45 }
  0x32   :  { %v1333_v51 = vadd.f32 %v1332_v48, %v693_v44  ;;  %v77_v48 = vld [vmem:[#allocation2 + $0x138] sm:$0xff] }
  0x33   :  { %v717_v52 = vand.u32 2147483647, %v77_v48 }
  0x34   :  { %v1334_v54 = vadd.f32 %v1333_v51, %v694_v47  ;;  %v78_v51 = vld [vmem:[#allocation2 + $0x140] sm:$0xff] }
  0x35   :  { %v718_v55 = vand.u32 2147483647, %v78_v51 }
  0x36   :  { %v1335_v57 = vadd.f32 %v1334_v54, %v695_v50  ;;  %v79_v54 = vld [vmem:[#allocation2 + $0x148] sm:$0xff] }
  0x37   :  { %v719_v58 = vand.u32 2147483647, %v79_v54 }
  0x38   :  { %v1336_v60 = vadd.f32 %v1335_v57, %v696_v53  ;;  %v80_v57 = vld [vmem:[#allocation2 + $0x150] sm:$0xff] }
  0x39   :  { %v720_v61 = vand.u32 2147483647, %v80_v57 }
  0x3a   :  { %v1337_v63 = vadd.f32 %v1336_v60, %v697_v56  ;;  %v81_v60 = vld [vmem:[#allocation2 + $0x158] sm:$0xff] }
  0x3b   :  { %v721_v0 = vand.u32 2147483647, %v81_v60 }
  0x3c   :  { %v1338_v2 = vadd.f32 %v1337_v63, %v698_v59  ;;  %v82_v63 = vld [vmem:[#allocation2 + $0x160] sm:$0xff] }
  0x3d   :  { %v722_v3 = vand.u32 2147483647, %v82_v63 }
  0x3e   :  { %v1339_v5 = vadd.f32 %v1338_v2, %v699_v62  ;;  %v83_v2 = vld [vmem:[#allocation2 + $0x168] sm:$0xff] }
  0x3f   :  { %v723_v6 = vand.u32 2147483647, %v83_v2 }
  0x40   :  { %v1340_v8 = vadd.f32 %v1339_v5, %v700_v1  ;;  %v84_v5 = vld [vmem:[#allocation2 + $0x170] sm:$0xff] }
  0x41   :  { %v724_v9 = vand.u32 2147483647, %v84_v5 }
  0x42   :  { %v1341_v11 = vadd.f32 %v1340_v8, %v701_v4  ;;  %v85_v8 = vld [vmem:[#allocation2 + $0x178] sm:$0xff] }
  0x43   :  { %v725_v12 = vand.u32 2147483647, %v85_v8 }
  0x44   :  { %v1342_v14 = vadd.f32 %v1341_v11, %v702_v7  ;;  %v86_v11 = vld [vmem:[#allocation2 + $0x180] sm:$0xff] }
  0x45   :  { %v726_v15 = vand.u32 2147483647, %v86_v11 }
  0x46   :  { %v1343_v17 = vadd.f32 %v1342_v14, %v703_v10  ;;  %v87_v14 = vld [vmem:[#allocation2 + $0x188] sm:$0xff] }
  0x47   :  { %v727_v18 = vand.u32 2147483647, %v87_v14 }
  0x48   :  { %v1344_v20 = vadd.f32 %v1343_v17, %v704_v13  ;;  %v88_v17 = vld [vmem:[#allocation2 + $0x190] sm:$0xff] }
  0x49   :  { %v728_v21 = vand.u32 2147483647, %v88_v17 }
  0x4a   :  { %v1345_v23 = vadd.f32 %v1344_v20, %v705_v16  ;;  %v89_v20 = vld [vmem:[#allocation2 + $0x198] sm:$0xff] }
  0x4b   :  { %v729_v24 = vand.u32 2147483647, %v89_v20 }
  0x4c   :  { %v1346_v26 = vadd.f32 %v1345_v23, %v706_v19  ;;  %v90_v23 = vld [vmem:[#allocation2 + $0x1a0] sm:$0xff] }
  0x4d   :  { %v730_v27 = vand.u32 2147483647, %v90_v23 }
  0x4e   :  { %v1347_v29 = vadd.f32 %v1346_v26, %v707_v22  ;;  %v91_v26 = vld [vmem:[#allocation2 + $0x1a8] sm:$0xff] }
  0x4f   :  { %v731_v30 = vand.u32 2147483647, %v91_v26 }
  0x50   :  { %v1348_v32 = vadd.f32 %v1347_v29, %v708_v25  ;;  %v92_v29 = vld [vmem:[#allocation2 + $0x1b0] sm:$0xff] }
  0x51   :  { %v732_v33 = vand.u32 2147483647, %v92_v29 }
  0x52   :  { %v1349_v35 = vadd.f32 %v1348_v32, %v709_v28  ;;  %v93_v32 = vld [vmem:[#allocation2 + $0x1b8] sm:$0xff] }
  0x53   :  { %v733_v36 = vand.u32 2147483647, %v93_v32 }
  0x54   :  { %v1350_v38 = vadd.f32 %v1349_v35, %v710_v31  ;;  %v94_v35 = vld [vmem:[#allocation2 + $0x1c0] sm:$0xff] }
  0x55   :  { %v734_v39 = vand.u32 2147483647, %v94_v35 }
  0x56   :  { %v1351_v41 = vadd.f32 %v1350_v38, %v711_v34  ;;  %v95_v38 = vld [vmem:[#allocation2 + $0x1c8] sm:$0xff] }
  0x57   :  { %v735_v42 = vand.u32 2147483647, %v95_v38 }
  0x58   :  { %v1352_v44 = vadd.f32 %v1351_v41, %v712_v37  ;;  %v96_v41 = vld [vmem:[#allocation2 + $0x1d0] sm:$0xff] }
  0x59   :  { %v736_v45 = vand.u32 2147483647, %v96_v41 }
  0x5a   :  { %v1353_v47 = vadd.f32 %v1352_v44, %v713_v40  ;;  %v97_v44 = vld [vmem:[#allocation2 + $0x1d8] sm:$0xff] }
  0x5b   :  { %v737_v48 = vand.u32 2147483647, %v97_v44 }
  0x5c   :  { %v1354_v50 = vadd.f32 %v1353_v47, %v714_v43  ;;  %v98_v47 = vld [vmem:[#allocation2 + $0x1e0] sm:$0xff] }
  0x5d   :  { %v738_v51 = vand.u32 2147483647, %v98_v47 }
  0x5e   :  { %v1355_v53 = vadd.f32 %v1354_v50, %v715_v46  ;;  %v99_v50 = vld [vmem:[#allocation2 + $0x1e8] sm:$0xff] }
  0x5f   :  { %v739_v54 = vand.u32 2147483647, %v99_v50 }
  0x60   :  { %v1356_v56 = vadd.f32 %v1355_v53, %v716_v49  ;;  %v100_v53 = vld [vmem:[#allocation2 + $0x1f0] sm:$0xff] }
  0x61   :  { %v740_v57 = vand.u32 2147483647, %v100_v53 }
  0x62   :  { %v1357_v59 = vadd.f32 %v1356_v56, %v717_v52  ;;  %v101_v56 = vld [vmem:[#allocation2 + $0x1f8] sm:$0xff] }
  0x63   :  { %v741_v60 = vand.u32 2147483647, %v101_v56 }
  0x64   :  { %v1358_v62 = vadd.f32 %v1357_v59, %v718_v55  ;;  %v102_v59 = vld [vmem:[#allocation2 + $0x200] sm:$0xff] }
  0x65   :  { %v742_v63 = vand.u32 2147483647, %v102_v59 }
  0x66   :  { %v1359_v1 = vadd.f32 %v1358_v62, %v719_v58  ;;  %v103_v62 = vld [vmem:[#allocation2 + $0x208] sm:$0xff] }
  0x67   :  { %v743_v2 = vand.u32 2147483647, %v103_v62 }
  0x68   :  { %v1360_v4 = vadd.f32 %v1359_v1, %v720_v61  ;;  %v104_v1 = vld [vmem:[#allocation2 + $0x210] sm:$0xff] }
  0x69   :  { %v744_v5 = vand.u32 2147483647, %v104_v1 }
  0x6a   :  { %v1361_v7 = vadd.f32 %v1360_v4, %v721_v0  ;;  %v105_v4 = vld [vmem:[#allocation2 + $0x218] sm:$0xff] }
  0x6b   :  { %v745_v8 = vand.u32 2147483647, %v105_v4 }
  0x6c   :  { %v1362_v10 = vadd.f32 %v1361_v7, %v722_v3  ;;  %v106_v7 = vld [vmem:[#allocation2 + $0x220] sm:$0xff] }
  0x6d   :  { %v746_v11 = vand.u32 2147483647, %v106_v7 }
  0x6e   :  { %v1363_v13 = vadd.f32 %v1362_v10, %v723_v6  ;;  %v107_v10 = vld [vmem:[#allocation2 + $0x228] sm:$0xff] }
  0x6f   :  { %v747_v14 = vand.u32 2147483647, %v107_v10 }
  0x70   :  { %v1364_v16 = vadd.f32 %v1363_v13, %v724_v9  ;;  %v108_v13 = vld [vmem:[#allocation2 + $0x230] sm:$0xff] }
  0x71   :  { %v748_v17 = vand.u32 2147483647, %v108_v13 }
  0x72   :  { %v1365_v19 = vadd.f32 %v1364_v16, %v725_v12  ;;  %v109_v16 = vld [vmem:[#allocation2 + $0x238] sm:$0xff] }
  0x73   :  { %v749_v20 = vand.u32 2147483647, %v109_v16 }
  0x74   :  { %v1366_v22 = vadd.f32 %v1365_v19, %v726_v15  ;;  %v110_v19 = vld [vmem:[#allocation2 + $0x240] sm:$0xff] }
  0x75   :  { %v750_v23 = vand.u32 2147483647, %v110_v19 }
  0x76   :  { %v1367_v25 = vadd.f32 %v1366_v22, %v727_v18  ;;  %v111_v22 = vld [vmem:[#allocation2 + $0x248] sm:$0xff] }
  0x77   :  { %v751_v26 = vand.u32 2147483647, %v111_v22 }
  0x78   :  { %v1368_v28 = vadd.f32 %v1367_v25, %v728_v21  ;;  %v112_v25 = vld [vmem:[#allocation2 + $0x250] sm:$0xff] }
  0x79   :  { %v752_v29 = vand.u32 2147483647, %v112_v25 }
  0x7a   :  { %v1369_v31 = vadd.f32 %v1368_v28, %v729_v24  ;;  %v113_v28 = vld [vmem:[#allocation2 + $0x258] sm:$0xff] }
  0x7b   :  { %v753_v32 = vand.u32 2147483647, %v113_v28 }
  0x7c   :  { %v1370_v34 = vadd.f32 %v1369_v31, %v730_v27  ;;  %v114_v31 = vld [vmem:[#allocation2 + $0x260] sm:$0xff] }
  0x7d   :  { %v754_v35 = vand.u32 2147483647, %v114_v31 }
  0x7e   :  { %v1371_v37 = vadd.f32 %v1370_v34, %v731_v30  ;;  %v115_v34 = vld [vmem:[#allocation2 + $0x268] sm:$0xff] }
  0x7f   :  { %v755_v38 = vand.u32 2147483647, %v115_v34 }
  0x80   :  { %v1372_v40 = vadd.f32 %v1371_v37, %v732_v33  ;;  %v116_v37 = vld [vmem:[#allocation2 + $0x270] sm:$0xff] }
  0x81   :  { %v756_v41 = vand.u32 2147483647, %v116_v37 }
  0x82   :  { %v1373_v43 = vadd.f32 %v1372_v40, %v733_v36  ;;  %v117_v40 = vld [vmem:[#allocation2 + $0x278] sm:$0xff] }
  0x83   :  { %v757_v44 = vand.u32 2147483647, %v117_v40 }
  0x84   :  { %v1374_v46 = vadd.f32 %v1373_v43, %v734_v39  ;;  %v118_v43 = vld [vmem:[#allocation2 + $0x280] sm:$0xff] }
  0x85   :  { %v758_v47 = vand.u32 2147483647, %v118_v43 }
  0x86   :  { %v1375_v49 = vadd.f32 %v1374_v46, %v735_v42  ;;  %v119_v46 = vld [vmem:[#allocation2 + $0x288] sm:$0xff] }
  0x87   :  { %v759_v50 = vand.u32 2147483647, %v119_v46 }
  0x88   :  { %v1376_v52 = vadd.f32 %v1375_v49, %v736_v45  ;;  %v120_v49 = vld [vmem:[#allocation2 + $0x290] sm:$0xff] }
  0x89   :  { %v760_v53 = vand.u32 2147483647, %v120_v49 }
  0x8a   :  { %v1377_v55 = vadd.f32 %v1376_v52, %v737_v48  ;;  %v121_v52 = vld [vmem:[#allocation2 + $0x298] sm:$0xff] }
  0x8b   :  { %v761_v56 = vand.u32 2147483647, %v121_v52 }
  0x8c   :  { %v1378_v58 = vadd.f32 %v1377_v55, %v738_v51  ;;  %v122_v55 = vld [vmem:[#allocation2 + $0x2a0] sm:$0xff] }
  0x8d   :  { %v762_v59 = vand.u32 2147483647, %v122_v55 }
  0x8e   :  { %v1379_v61 = vadd.f32 %v1378_v58, %v739_v54  ;;  %v123_v58 = vld [vmem:[#allocation2 + $0x2a8] sm:$0xff] }
  0x8f   :  { %v763_v62 = vand.u32 2147483647, %v123_v58 }
  0x90   :  { %v1380_v0 = vadd.f32 %v1379_v61, %v740_v57  ;;  %v124_v61 = vld [vmem:[#allocation2 + $0x2b0] sm:$0xff] }
  0x91   :  { %v764_v1 = vand.u32 2147483647, %v124_v61 }
  0x92   :  { %v1381_v3 = vadd.f32 %v1380_v0, %v741_v60  ;;  %v125_v0 = vld [vmem:[#allocation2 + $0x2b8] sm:$0xff] }
  0x93   :  { %v765_v4 = vand.u32 2147483647, %v125_v0 }
  0x94   :  { %v1382_v6 = vadd.f32 %v1381_v3, %v742_v63  ;;  %v126_v3 = vld [vmem:[#allocation2 + $0x2c0] sm:$0xff] }
  0x95   :  { %v766_v7 = vand.u32 2147483647, %v126_v3 }
  0x96   :  { %v1383_v9 = vadd.f32 %v1382_v6, %v743_v2  ;;  %v127_v6 = vld [vmem:[#allocation2 + $0x2c8] sm:$0xff] }
  0x97   :  { %v767_v10 = vand.u32 2147483647, %v127_v6 }
  0x98   :  { %v1384_v12 = vadd.f32 %v1383_v9, %v744_v5  ;;  %v128_v9 = vld [vmem:[#allocation2 + $0x2d0] sm:$0xff] }
  0x99   :  { %v768_v13 = vand.u32 2147483647, %v128_v9 }
  0x9a   :  { %v1385_v15 = vadd.f32 %v1384_v12, %v745_v8  ;;  %v129_v12 = vld [vmem:[#allocation2 + $0x2d8] sm:$0xff] }
  0x9b   :  { %v769_v16 = vand.u32 2147483647, %v129_v12 }
  0x9c   :  { %v1386_v18 = vadd.f32 %v1385_v15, %v746_v11  ;;  %v130_v15 = vld [vmem:[#allocation2 + $0x2e0] sm:$0xff] }
  0x9d   :  { %v770_v19 = vand.u32 2147483647, %v130_v15 }
  0x9e   :  { %v1387_v21 = vadd.f32 %v1386_v18, %v747_v14  ;;  %v131_v18 = vld [vmem:[#allocation2 + $0x2e8] sm:$0xff] }
  0x9f   :  { %v771_v22 = vand.u32 2147483647, %v131_v18 }
  0xa0   :  { %v1388_v24 = vadd.f32 %v1387_v21, %v748_v17  ;;  %v132_v21 = vld [vmem:[#allocation2 + $0x2f0] sm:$0xff] }
  0xa1   :  { %v772_v25 = vand.u32 2147483647, %v132_v21 }
  0xa2   :  { %v1389_v27 = vadd.f32 %v1388_v24, %v749_v20  ;;  %v133_v24 = vld [vmem:[#allocation2 + $0x2f8] sm:$0xff] }
  0xa3   :  { %v773_v28 = vand.u32 2147483647, %v133_v24 }
  0xa4   :  { %v1390_v30 = vadd.f32 %v1389_v27, %v750_v23  ;;  %v134_v27 = vld [vmem:[#allocation2 + $0x300] sm:$0xff] }
  0xa5   :  { %v774_v31 = vand.u32 2147483647, %v134_v27 }
  0xa6   :  { %v1391_v33 = vadd.f32 %v1390_v30, %v751_v26  ;;  %v135_v30 = vld [vmem:[#allocation2 + $0x308] sm:$0xff] }
  0xa7   :  { %v775_v34 = vand.u32 2147483647, %v135_v30 }
  0xa8   :  { %v1392_v36 = vadd.f32 %v1391_v33, %v752_v29  ;;  %v136_v33 = vld [vmem:[#allocation2 + $0x310] sm:$0xff] }
  0xa9   :  { %v776_v37 = vand.u32 2147483647, %v136_v33 }
  0xaa   :  { %v1393_v39 = vadd.f32 %v1392_v36, %v753_v32  ;;  %v137_v36 = vld [vmem:[#allocation2 + $0x318] sm:$0xff] }
  0xab   :  { %v777_v40 = vand.u32 2147483647, %v137_v36 }
  0xac   :  { %v1394_v42 = vadd.f32 %v1393_v39, %v754_v35  ;;  %v138_v39 = vld [vmem:[#allocation2 + $0x320] sm:$0xff] }
  0xad   :  { %v778_v43 = vand.u32 2147483647, %v138_v39 }
  0xae   :  { %v1395_v45 = vadd.f32 %v1394_v42, %v755_v38  ;;  %v139_v42 = vld [vmem:[#allocation2 + $0x328] sm:$0xff] }
  0xaf   :  { %v779_v46 = vand.u32 2147483647, %v139_v42 }
  0xb0   :  { %v1396_v48 = vadd.f32 %v1395_v45, %v756_v41  ;;  %v140_v45 = vld [vmem:[#allocation2 + $0x330] sm:$0xff] }
  0xb1   :  { %v780_v49 = vand.u32 2147483647, %v140_v45 }
  0xb2   :  { %v1397_v51 = vadd.f32 %v1396_v48, %v757_v44  ;;  %v141_v48 = vld [vmem:[#allocation2 + $0x338] sm:$0xff] }
  0xb3   :  { %v781_v52 = vand.u32 2147483647, %v141_v48 }
  0xb4   :  { %v1398_v54 = vadd.f32 %v1397_v51, %v758_v47  ;;  %v142_v51 = vld [vmem:[#allocation2 + $0x340] sm:$0xff] }
  0xb5   :  { %v782_v55 = vand.u32 2147483647, %v142_v51 }
  0xb6   :  { %v1399_v57 = vadd.f32 %v1398_v54, %v759_v50  ;;  %v143_v54 = vld [vmem:[#allocation2 + $0x348] sm:$0xff] }
  0xb7   :  { %v783_v58 = vand.u32 2147483647, %v143_v54 }
  0xb8   :  { %v1400_v60 = vadd.f32 %v1399_v57, %v760_v53  ;;  %v144_v57 = vld [vmem:[#allocation2 + $0x350] sm:$0xff] }
  0xb9   :  { %v784_v61 = vand.u32 2147483647, %v144_v57 }
  0xba   :  { %v1401_v63 = vadd.f32 %v1400_v60, %v761_v56  ;;  %v145_v60 = vld [vmem:[#allocation2 + $0x358] sm:$0xff] }
  0xbb   :  { %v785_v0 = vand.u32 2147483647, %v145_v60 }
  0xbc   :  { %v1402_v2 = vadd.f32 %v1401_v63, %v762_v59  ;;  %v146_v63 = vld [vmem:[#allocation2 + $0x360] sm:$0xff] }
  0xbd   :  { %v786_v3 = vand.u32 2147483647, %v146_v63 }
  0xbe   :  { %v1403_v5 = vadd.f32 %v1402_v2, %v763_v62  ;;  %v147_v2 = vld [vmem:[#allocation2 + $0x368] sm:$0xff] }
  0xbf   :  { %v787_v6 = vand.u32 2147483647, %v147_v2 }
  0xc0   :  { %v1404_v8 = vadd.f32 %v1403_v5, %v764_v1  ;;  %v148_v5 = vld [vmem:[#allocation2 + $0x370] sm:$0xff] }
  0xc1   :  { %v788_v9 = vand.u32 2147483647, %v148_v5 }
  0xc2   :  { %v1405_v11 = vadd.f32 %v1404_v8, %v765_v4  ;;  %v149_v8 = vld [vmem:[#allocation2 + $0x378] sm:$0xff] }
  0xc3   :  { %v789_v12 = vand.u32 2147483647, %v149_v8 }
  0xc4   :  { %v1406_v14 = vadd.f32 %v1405_v11, %v766_v7  ;;  %v150_v11 = vld [vmem:[#allocation2 + $0x380] sm:$0xff] }
  0xc5   :  { %v790_v15 = vand.u32 2147483647, %v150_v11 }
  0xc6   :  { %v1407_v17 = vadd.f32 %v1406_v14, %v767_v10  ;;  %v151_v14 = vld [vmem:[#allocation2 + $0x388] sm:$0xff] }
  0xc7   :  { %v791_v18 = vand.u32 2147483647, %v151_v14 }
  0xc8   :  { %v1408_v20 = vadd.f32 %v1407_v17, %v768_v13  ;;  %v152_v17 = vld [vmem:[#allocation2 + $0x390] sm:$0xff] }
  0xc9   :  { %v792_v21 = vand.u32 2147483647, %v152_v17 }
  0xca   :  { %v1409_v23 = vadd.f32 %v1408_v20, %v769_v16  ;;  %v153_v20 = vld [vmem:[#allocation2 + $0x398] sm:$0xff] }
  0xcb   :  { %v793_v24 = vand.u32 2147483647, %v153_v20 }
  0xcc   :  { %v1410_v26 = vadd.f32 %v1409_v23, %v770_v19  ;;  %v154_v23 = vld [vmem:[#allocation2 + $0x3a0] sm:$0xff] }
  0xcd   :  { %v794_v27 = vand.u32 2147483647, %v154_v23 }
  0xce   :  { %v1411_v29 = vadd.f32 %v1410_v26, %v771_v22  ;;  %v155_v26 = vld [vmem:[#allocation2 + $0x3a8] sm:$0xff] }
  0xcf   :  { %v795_v30 = vand.u32 2147483647, %v155_v26 }
  0xd0   :  { %v1412_v32 = vadd.f32 %v1411_v29, %v772_v25  ;;  %v156_v29 = vld [vmem:[#allocation2 + $0x3b0] sm:$0xff] }
  0xd1   :  { %v796_v33 = vand.u32 2147483647, %v156_v29 }
  0xd2   :  { %v1413_v35 = vadd.f32 %v1412_v32, %v773_v28  ;;  %v157_v32 = vld [vmem:[#allocation2 + $0x3b8] sm:$0xff] }
  0xd3   :  { %v797_v36 = vand.u32 2147483647, %v157_v32 }
  0xd4   :  { %v1414_v38 = vadd.f32 %v1413_v35, %v774_v31  ;;  %v158_v35 = vld [vmem:[#allocation2 + $0x3c0] sm:$0xff] }
  0xd5   :  { %v798_v39 = vand.u32 2147483647, %v158_v35 }
  0xd6   :  { %v1415_v41 = vadd.f32 %v1414_v38, %v775_v34  ;;  %v159_v38 = vld [vmem:[#allocation2 + $0x3c8] sm:$0xff] }
  0xd7   :  { %v799_v42 = vand.u32 2147483647, %v159_v38 }
  0xd8   :  { %v1416_v44 = vadd.f32 %v1415_v41, %v776_v37  ;;  %v160_v41 = vld [vmem:[#allocation2 + $0x3d0] sm:$0xff] }
  0xd9   :  { %v800_v45 = vand.u32 2147483647, %v160_v41 }
  0xda   :  { %v1417_v47 = vadd.f32 %v1416_v44, %v777_v40  ;;  %v161_v44 = vld [vmem:[#allocation2 + $0x3d8] sm:$0xff] }
  0xdb   :  { %v801_v48 = vand.u32 2147483647, %v161_v44 }
  0xdc   :  { %v1418_v50 = vadd.f32 %v1417_v47, %v778_v43  ;;  %v162_v47 = vld [vmem:[#allocation2 + $0x3e0] sm:$0xff] }
  0xdd   :  { %v802_v51 = vand.u32 2147483647, %v162_v47 }
  0xde   :  { %v1419_v53 = vadd.f32 %v1418_v50, %v779_v46  ;;  %v163_v50 = vld [vmem:[#allocation2 + $0x3e8] sm:$0xff] }
  0xdf   :  { %v803_v54 = vand.u32 2147483647, %v163_v50 }
  0xe0   :  { %v1420_v56 = vadd.f32 %v1419_v53, %v780_v49  ;;  %v164_v53 = vld [vmem:[#allocation2 + $0x3f0] sm:$0xff] }
  0xe1   :  { %v804_v57 = vand.u32 2147483647, %v164_v53 }
  0xe2   :  { %v1421_v59 = vadd.f32 %v1420_v56, %v781_v52  ;;  %v165_v56 = vld [vmem:[#allocation2 + $0x3f8] sm:$0xff] }
  0xe3   :  { %v805_v60 = vand.u32 2147483647, %v165_v56 }
  0xe4   :  { %v1422_v62 = vadd.f32 %v1421_v59, %v782_v55  ;;  %v166_v59 = vld [vmem:[#allocation2 + $0x400] sm:$0xff] }
  0xe5   :  { %v806_v63 = vand.u32 2147483647, %v166_v59 }
  0xe6   :  { %v1423_v1 = vadd.f32 %v1422_v62, %v783_v58  ;;  %v167_v62 = vld [vmem:[#allocation2 + $0x408] sm:$0xff] }
  0xe7   :  { %v807_v2 = vand.u32 2147483647, %v167_v62 }
  0xe8   :  { %v1424_v4 = vadd.f32 %v1423_v1, %v784_v61  ;;  %v168_v1 = vld [vmem:[#allocation2 + $0x410] sm:$0xff] }
  0xe9   :  { %v808_v5 = vand.u32 2147483647, %v168_v1 }
  0xea   :  { %v1425_v7 = vadd.f32 %v1424_v4, %v785_v0  ;;  %v169_v4 = vld [vmem:[#allocation2 + $0x418] sm:$0xff] }
  0xeb   :  { %v809_v8 = vand.u32 2147483647, %v169_v4 }
  0xec   :  { %v1426_v10 = vadd.f32 %v1425_v7, %v786_v3  ;;  %v170_v7 = vld [vmem:[#allocation2 + $0x420] sm:$0xff] }
  0xed   :  { %v810_v11 = vand.u32 2147483647, %v170_v7 }
  0xee   :  { %v1427_v13 = vadd.f32 %v1426_v10, %v787_v6  ;;  %v171_v10 = vld [vmem:[#allocation2 + $0x428] sm:$0xff] }
  0xef   :  { %v811_v14 = vand.u32 2147483647, %v171_v10 }
  0xf0   :  { %v1428_v16 = vadd.f32 %v1427_v13, %v788_v9  ;;  %v172_v13 = vld [vmem:[#allocation2 + $0x430] sm:$0xff] }
  0xf1   :  { %v812_v17 = vand.u32 2147483647, %v172_v13 }
  0xf2   :  { %v1429_v19 = vadd.f32 %v1428_v16, %v789_v12  ;;  %v173_v16 = vld [vmem:[#allocation2 + $0x438] sm:$0xff] }
  0xf3   :  { %v813_v20 = vand.u32 2147483647, %v173_v16 }
  0xf4   :  { %v1430_v22 = vadd.f32 %v1429_v19, %v790_v15  ;;  %v174_v19 = vld [vmem:[#allocation2 + $0x440] sm:$0xff] }
  0xf5   :  { %v814_v23 = vand.u32 2147483647, %v174_v19 }
  0xf6   :  { %v1431_v25 = vadd.f32 %v1430_v22, %v791_v18  ;;  %v175_v22 = vld [vmem:[#allocation2 + $0x448] sm:$0xff] }
  0xf7   :  { %v815_v26 = vand.u32 2147483647, %v175_v22 }
  0xf8   :  { %v1432_v28 = vadd.f32 %v1431_v25, %v792_v21  ;;  %v176_v25 = vld [vmem:[#allocation2 + $0x450] sm:$0xff] }
  0xf9   :  { %v816_v29 = vand.u32 2147483647, %v176_v25 }
  0xfa   :  { %v1433_v31 = vadd.f32 %v1432_v28, %v793_v24  ;;  %v177_v28 = vld [vmem:[#allocation2 + $0x458] sm:$0xff] }
  0xfb   :  { %v817_v32 = vand.u32 2147483647, %v177_v28 }
  0xfc   :  { %v1434_v34 = vadd.f32 %v1433_v31, %v794_v27  ;;  %v178_v31 = vld [vmem:[#allocation2 + $0x460] sm:$0xff] }
  0xfd   :  { %v818_v35 = vand.u32 2147483647, %v178_v31 }
  0xfe   :  { %v1435_v37 = vadd.f32 %v1434_v34, %v795_v30  ;;  %v179_v34 = vld [vmem:[#allocation2 + $0x468] sm:$0xff] }
  0xff   :  { %v819_v38 = vand.u32 2147483647, %v179_v34 }
 0x100   :  { %v1436_v40 = vadd.f32 %v1435_v37, %v796_v33  ;;  %v180_v37 = vld [vmem:[#allocation2 + $0x470] sm:$0xff] }
 0x101   :  { %v820_v41 = vand.u32 2147483647, %v180_v37 }
 0x102   :  { %v1437_v43 = vadd.f32 %v1436_v40, %v797_v36  ;;  %v181_v40 = vld [vmem:[#allocation2 + $0x478] sm:$0xff] }
 0x103   :  { %v821_v44 = vand.u32 2147483647, %v181_v40 }
 0x104   :  { %v1438_v46 = vadd.f32 %v1437_v43, %v798_v39  ;;  %v182_v43 = vld [vmem:[#allocation2 + $0x480] sm:$0xff] }
 0x105   :  { %v822_v47 = vand.u32 2147483647, %v182_v43 }
 0x106   :  { %v1439_v49 = vadd.f32 %v1438_v46, %v799_v42  ;;  %v183_v46 = vld [vmem:[#allocation2 + $0x488] sm:$0xff] }
 0x107   :  { %v823_v50 = vand.u32 2147483647, %v183_v46 }
 0x108   :  { %v1440_v52 = vadd.f32 %v1439_v49, %v800_v45  ;;  %v184_v49 = vld [vmem:[#allocation2 + $0x490] sm:$0xff] }
 0x109   :  { %v824_v53 = vand.u32 2147483647, %v184_v49 }
 0x10a   :  { %v1441_v55 = vadd.f32 %v1440_v52, %v801_v48  ;;  %v185_v52 = vld [vmem:[#allocation2 + $0x498] sm:$0xff] }
 0x10b   :  { %v825_v56 = vand.u32 2147483647, %v185_v52 }
 0x10c   :  { %v1442_v58 = vadd.f32 %v1441_v55, %v802_v51  ;;  %v186_v55 = vld [vmem:[#allocation2 + $0x4a0] sm:$0xff] }
 0x10d   :  { %v826_v59 = vand.u32 2147483647, %v186_v55 }
 0x10e   :  { %v1443_v61 = vadd.f32 %v1442_v58, %v803_v54  ;;  %v187_v58 = vld [vmem:[#allocation2 + $0x4a8] sm:$0xff] }
 0x10f   :  { %v827_v62 = vand.u32 2147483647, %v187_v58 }
 0x110   :  { %v1444_v0 = vadd.f32 %v1443_v61, %v804_v57  ;;  %v188_v61 = vld [vmem:[#allocation2 + $0x4b0] sm:$0xff] }
 0x111   :  { %v828_v1 = vand.u32 2147483647, %v188_v61 }
 0x112   :  { %v1445_v3 = vadd.f32 %v1444_v0, %v805_v60  ;;  %v189_v0 = vld [vmem:[#allocation2 + $0x4b8] sm:$0xff] }
 0x113   :  { %v829_v4 = vand.u32 2147483647, %v189_v0 }
 0x114   :  { %v1446_v6 = vadd.f32 %v1445_v3, %v806_v63  ;;  %v190_v3 = vld [vmem:[#allocation2 + $0x4c0] sm:$0xff] }
 0x115   :  { %v830_v7 = vand.u32 2147483647, %v190_v3 }
 0x116   :  { %v1447_v9 = vadd.f32 %v1446_v6, %v807_v2  ;;  %v191_v6 = vld [vmem:[#allocation2 + $0x4c8] sm:$0xff] }
 0x117   :  { %v831_v10 = vand.u32 2147483647, %v191_v6 }
 0x118   :  { %v1448_v12 = vadd.f32 %v1447_v9, %v808_v5  ;;  %v192_v9 = vld [vmem:[#allocation2 + $0x4d0] sm:$0xff] }
 0x119   :  { %v832_v13 = vand.u32 2147483647, %v192_v9 }
 0x11a   :  { %v1449_v15 = vadd.f32 %v1448_v12, %v809_v8  ;;  %v193_v12 = vld [vmem:[#allocation2 + $0x4d8] sm:$0xff] }
 0x11b   :  { %v833_v16 = vand.u32 2147483647, %v193_v12 }
 0x11c   :  { %v1450_v18 = vadd.f32 %v1449_v15, %v810_v11  ;;  %v194_v15 = vld [vmem:[#allocation2 + $0x4e0] sm:$0xff] }
 0x11d   :  { %v834_v19 = vand.u32 2147483647, %v194_v15 }
 0x11e   :  { %v1451_v21 = vadd.f32 %v1450_v18, %v811_v14  ;;  %v195_v18 = vld [vmem:[#allocation2 + $0x4e8] sm:$0xff] }
 0x11f   :  { %v835_v22 = vand.u32 2147483647, %v195_v18 }
 0x120   :  { %v1452_v24 = vadd.f32 %v1451_v21, %v812_v17  ;;  %v196_v21 = vld [vmem:[#allocation2 + $0x4f0] sm:$0xff] }
 0x121   :  { %v836_v25 = vand.u32 2147483647, %v196_v21 }
 0x122   :  { %v1453_v27 = vadd.f32 %v1452_v24, %v813_v20  ;;  %v197_v24 = vld [vmem:[#allocation2 + $0x4f8] sm:$0xff] }
 0x123   :  { %v837_v28 = vand.u32 2147483647, %v197_v24 }
 0x124   :  { %v1454_v30 = vadd.f32 %v1453_v27, %v814_v23  ;;  %v198_v27 = vld [vmem:[#allocation2 + $0x500] sm:$0xff] }
 0x125   :  { %v838_v31 = vand.u32 2147483647, %v198_v27 }
 0x126   :  { %v1455_v33 = vadd.f32 %v1454_v30, %v815_v26  ;;  %v199_v30 = vld [vmem:[#allocation2 + $0x508] sm:$0xff] }
 0x127   :  { %v839_v34 = vand.u32 2147483647, %v199_v30 }
 0x128   :  { %v1456_v36 = vadd.f32 %v1455_v33, %v816_v29  ;;  %v200_v33 = vld [vmem:[#allocation2 + $0x510] sm:$0xff] }
 0x129   :  { %v840_v37 = vand.u32 2147483647, %v200_v33 }
 0x12a   :  { %v1457_v39 = vadd.f32 %v1456_v36, %v817_v32  ;;  %v201_v36 = vld [vmem:[#allocation2 + $0x518] sm:$0xff] }
 0x12b   :  { %v841_v40 = vand.u32 2147483647, %v201_v36 }
 0x12c   :  { %v1458_v42 = vadd.f32 %v1457_v39, %v818_v35  ;;  %v202_v39 = vld [vmem:[#allocation2 + $0x520] sm:$0xff] }
 0x12d   :  { %v842_v43 = vand.u32 2147483647, %v202_v39 }
 0x12e   :  { %v1459_v45 = vadd.f32 %v1458_v42, %v819_v38  ;;  %v203_v42 = vld [vmem:[#allocation2 + $0x528] sm:$0xff] }
 0x12f   :  { %v843_v46 = vand.u32 2147483647, %v203_v42 }
 0x130   :  { %v1460_v48 = vadd.f32 %v1459_v45, %v820_v41  ;;  %v204_v45 = vld [vmem:[#allocation2 + $0x530] sm:$0xff] }
 0x131   :  { %v844_v49 = vand.u32 2147483647, %v204_v45 }
 0x132   :  { %v1461_v51 = vadd.f32 %v1460_v48, %v821_v44  ;;  %v205_v48 = vld [vmem:[#allocation2 + $0x538] sm:$0xff] }
 0x133   :  { %v845_v52 = vand.u32 2147483647, %v205_v48 }
 0x134   :  { %v1462_v54 = vadd.f32 %v1461_v51, %v822_v47  ;;  %v206_v51 = vld [vmem:[#allocation2 + $0x540] sm:$0xff] }
 0x135   :  { %v846_v55 = vand.u32 2147483647, %v206_v51 }
 0x136   :  { %v1463_v57 = vadd.f32 %v1462_v54, %v823_v50  ;;  %v207_v54 = vld [vmem:[#allocation2 + $0x548] sm:$0xff] }
 0x137   :  { %v847_v58 = vand.u32 2147483647, %v207_v54 }
 0x138   :  { %v1464_v60 = vadd.f32 %v1463_v57, %v824_v53  ;;  %v208_v57 = vld [vmem:[#allocation2 + $0x550] sm:$0xff] }
 0x139   :  { %v848_v61 = vand.u32 2147483647, %v208_v57 }
 0x13a   :  { %v1465_v63 = vadd.f32 %v1464_v60, %v825_v56  ;;  %v209_v60 = vld [vmem:[#allocation2 + $0x558] sm:$0xff] }
 0x13b   :  { %v849_v0 = vand.u32 2147483647, %v209_v60 }
 0x13c   :  { %v1466_v2 = vadd.f32 %v1465_v63, %v826_v59  ;;  %v210_v63 = vld [vmem:[#allocation2 + $0x560] sm:$0xff] }
 0x13d   :  { %v850_v3 = vand.u32 2147483647, %v210_v63 }
 0x13e   :  { %v1467_v5 = vadd.f32 %v1466_v2, %v827_v62  ;;  %v211_v2 = vld [vmem:[#allocation2 + $0x568] sm:$0xff] }
 0x13f   :  { %v851_v6 = vand.u32 2147483647, %v211_v2 }
 0x140   :  { %v1468_v8 = vadd.f32 %v1467_v5, %v828_v1  ;;  %v212_v5 = vld [vmem:[#allocation2 + $0x570] sm:$0xff] }
 0x141   :  { %v852_v9 = vand.u32 2147483647, %v212_v5 }
 0x142   :  { %v1469_v11 = vadd.f32 %v1468_v8, %v829_v4  ;;  %v213_v8 = vld [vmem:[#allocation2 + $0x578] sm:$0xff] }
 0x143   :  { %v853_v12 = vand.u32 2147483647, %v213_v8 }
 0x144   :  { %v1470_v14 = vadd.f32 %v1469_v11, %v830_v7  ;;  %v214_v11 = vld [vmem:[#allocation2 + $0x580] sm:$0xff] }
 0x145   :  { %v854_v15 = vand.u32 2147483647, %v214_v11 }
 0x146   :  { %v1471_v17 = vadd.f32 %v1470_v14, %v831_v10  ;;  %v215_v14 = vld [vmem:[#allocation2 + $0x588] sm:$0xff] }
 0x147   :  { %v855_v18 = vand.u32 2147483647, %v215_v14 }
 0x148   :  { %v1472_v20 = vadd.f32 %v1471_v17, %v832_v13  ;;  %v216_v17 = vld [vmem:[#allocation2 + $0x590] sm:$0xff] }
 0x149   :  { %v856_v21 = vand.u32 2147483647, %v216_v17 }
 0x14a   :  { %v1473_v23 = vadd.f32 %v1472_v20, %v833_v16  ;;  %v217_v20 = vld [vmem:[#allocation2 + $0x598] sm:$0xff] }
 0x14b   :  { %v857_v24 = vand.u32 2147483647, %v217_v20 }
 0x14c   :  { %v1474_v26 = vadd.f32 %v1473_v23, %v834_v19  ;;  %v218_v23 = vld [vmem:[#allocation2 + $0x5a0] sm:$0xff] }
 0x14d   :  { %v858_v27 = vand.u32 2147483647, %v218_v23 }
 0x14e   :  { %v1475_v29 = vadd.f32 %v1474_v26, %v835_v22  ;;  %v219_v26 = vld [vmem:[#allocation2 + $0x5a8] sm:$0xff] }
 0x14f   :  { %v859_v30 = vand.u32 2147483647, %v219_v26 }
 0x150   :  { %v1476_v32 = vadd.f32 %v1475_v29, %v836_v25  ;;  %v220_v29 = vld [vmem:[#allocation2 + $0x5b0] sm:$0xff] }
 0x151   :  { %v860_v33 = vand.u32 2147483647, %v220_v29 }
 0x152   :  { %v1477_v35 = vadd.f32 %v1476_v32, %v837_v28  ;;  %v221_v32 = vld [vmem:[#allocation2 + $0x5b8] sm:$0xff] }
 0x153   :  { %v861_v36 = vand.u32 2147483647, %v221_v32 }
 0x154   :  { %v1478_v38 = vadd.f32 %v1477_v35, %v838_v31  ;;  %v222_v35 = vld [vmem:[#allocation2 + $0x5c0] sm:$0xff] }
 0x155   :  { %v862_v39 = vand.u32 2147483647, %v222_v35 }
 0x156   :  { %v1479_v41 = vadd.f32 %v1478_v38, %v839_v34  ;;  %v223_v38 = vld [vmem:[#allocation2 + $0x5c8] sm:$0xff] }
 0x157   :  { %v863_v42 = vand.u32 2147483647, %v223_v38 }
 0x158   :  { %v1480_v44 = vadd.f32 %v1479_v41, %v840_v37  ;;  %v224_v41 = vld [vmem:[#allocation2 + $0x5d0] sm:$0xff] }
 0x159   :  { %v864_v45 = vand.u32 2147483647, %v224_v41 }
 0x15a   :  { %v1481_v47 = vadd.f32 %v1480_v44, %v841_v40  ;;  %v225_v44 = vld [vmem:[#allocation2 + $0x5d8] sm:$0xff] }
 0x15b   :  { %v865_v48 = vand.u32 2147483647, %v225_v44 }
 0x15c   :  { %v1482_v50 = vadd.f32 %v1481_v47, %v842_v43  ;;  %v226_v47 = vld [vmem:[#allocation2 + $0x5e0] sm:$0xff] }
 0x15d   :  { %v866_v51 = vand.u32 2147483647, %v226_v47 }
 0x15e   :  { %v1483_v53 = vadd.f32 %v1482_v50, %v843_v46  ;;  %v227_v50 = vld [vmem:[#allocation2 + $0x5e8] sm:$0xff] }
 0x15f   :  { %v867_v54 = vand.u32 2147483647, %v227_v50 }
 0x160   :  { %v1484_v56 = vadd.f32 %v1483_v53, %v844_v49  ;;  %v228_v53 = vld [vmem:[#allocation2 + $0x5f0] sm:$0xff] }
 0x161   :  { %v868_v57 = vand.u32 2147483647, %v228_v53 }
 0x162   :  { %v1485_v59 = vadd.f32 %v1484_v56, %v845_v52  ;;  %v229_v56 = vld [vmem:[#allocation2 + $0x5f8] sm:$0xff] }
 0x163   :  { %v869_v60 = vand.u32 2147483647, %v229_v56 }
 0x164   :  { %v1486_v62 = vadd.f32 %v1485_v59, %v846_v55  ;;  %v230_v59 = vld [vmem:[#allocation2 + $0x600] sm:$0xff] }
 0x165   :  { %v870_v63 = vand.u32 2147483647, %v230_v59 }
 0x166   :  { %v1487_v1 = vadd.f32 %v1486_v62, %v847_v58  ;;  %v231_v62 = vld [vmem:[#allocation2 + $0x608] sm:$0xff] }
 0x167   :  { %v871_v2 = vand.u32 2147483647, %v231_v62 }
 0x168   :  { %v1488_v4 = vadd.f32 %v1487_v1, %v848_v61  ;;  %v232_v1 = vld [vmem:[#allocation2 + $0x610] sm:$0xff] }
 0x169   :  { %v872_v5 = vand.u32 2147483647, %v232_v1 }
 0x16a   :  { %v1489_v7 = vadd.f32 %v1488_v4, %v849_v0  ;;  %v233_v4 = vld [vmem:[#allocation2 + $0x618] sm:$0xff] }
 0x16b   :  { %v873_v8 = vand.u32 2147483647, %v233_v4 }
 0x16c   :  { %v1490_v10 = vadd.f32 %v1489_v7, %v850_v3  ;;  %v234_v7 = vld [vmem:[#allocation2 + $0x620] sm:$0xff] }
 0x16d   :  { %v874_v11 = vand.u32 2147483647, %v234_v7 }
 0x16e   :  { %v1491_v13 = vadd.f32 %v1490_v10, %v851_v6  ;;  %v235_v10 = vld [vmem:[#allocation2 + $0x628] sm:$0xff] }
 0x16f   :  { %v875_v14 = vand.u32 2147483647, %v235_v10 }
 0x170   :  { %v1492_v16 = vadd.f32 %v1491_v13, %v852_v9  ;;  %v236_v13 = vld [vmem:[#allocation2 + $0x630] sm:$0xff] }
 0x171   :  { %v876_v17 = vand.u32 2147483647, %v236_v13 }
 0x172   :  { %v1493_v19 = vadd.f32 %v1492_v16, %v853_v12  ;;  %v237_v16 = vld [vmem:[#allocation2 + $0x638] sm:$0xff] }
 0x173   :  { %v877_v20 = vand.u32 2147483647, %v237_v16 }
 0x174   :  { %v1494_v22 = vadd.f32 %v1493_v19, %v854_v15  ;;  %v238_v19 = vld [vmem:[#allocation2 + $0x640] sm:$0xff] }
 0x175   :  { %v878_v23 = vand.u32 2147483647, %v238_v19 }
 0x176   :  { %v1495_v25 = vadd.f32 %v1494_v22, %v855_v18  ;;  %v239_v22 = vld [vmem:[#allocation2 + $0x648] sm:$0xff] }
 0x177   :  { %v879_v26 = vand.u32 2147483647, %v239_v22 }
 0x178   :  { %v1496_v28 = vadd.f32 %v1495_v25, %v856_v21  ;;  %v240_v25 = vld [vmem:[#allocation2 + $0x650] sm:$0xff] }
 0x179   :  { %v880_v29 = vand.u32 2147483647, %v240_v25 }
 0x17a   :  { %v1497_v31 = vadd.f32 %v1496_v28, %v857_v24  ;;  %v241_v28 = vld [vmem:[#allocation2 + $0x658] sm:$0xff] }
 0x17b   :  { %v881_v32 = vand.u32 2147483647, %v241_v28 }
 0x17c   :  { %v1498_v34 = vadd.f32 %v1497_v31, %v858_v27  ;;  %v242_v31 = vld [vmem:[#allocation2 + $0x660] sm:$0xff] }
 0x17d   :  { %v882_v35 = vand.u32 2147483647, %v242_v31 }
 0x17e   :  { %v1499_v37 = vadd.f32 %v1498_v34, %v859_v30  ;;  %v243_v34 = vld [vmem:[#allocation2 + $0x668] sm:$0xff] }
 0x17f   :  { %v883_v38 = vand.u32 2147483647, %v243_v34 }
 0x180   :  { %v1500_v40 = vadd.f32 %v1499_v37, %v860_v33  ;;  %v244_v37 = vld [vmem:[#allocation2 + $0x670] sm:$0xff] }
 0x181   :  { %v884_v41 = vand.u32 2147483647, %v244_v37 }
 0x182   :  { %v1501_v43 = vadd.f32 %v1500_v40, %v861_v36  ;;  %v245_v40 = vld [vmem:[#allocation2 + $0x678] sm:$0xff] }
 0x183   :  { %v885_v44 = vand.u32 2147483647, %v245_v40 }
 0x184   :  { %v1502_v46 = vadd.f32 %v1501_v43, %v862_v39  ;;  %v246_v43 = vld [vmem:[#allocation2 + $0x680] sm:$0xff] }
 0x185   :  { %v886_v47 = vand.u32 2147483647, %v246_v43 }
 0x186   :  { %v1503_v49 = vadd.f32 %v1502_v46, %v863_v42  ;;  %v247_v46 = vld [vmem:[#allocation2 + $0x688] sm:$0xff] }
 0x187   :  { %v887_v50 = vand.u32 2147483647, %v247_v46 }
 0x188   :  { %v1504_v52 = vadd.f32 %v1503_v49, %v864_v45  ;;  %v248_v49 = vld [vmem:[#allocation2 + $0x690] sm:$0xff] }
 0x189   :  { %v888_v53 = vand.u32 2147483647, %v248_v49 }
 0x18a   :  { %v1505_v55 = vadd.f32 %v1504_v52, %v865_v48  ;;  %v249_v52 = vld [vmem:[#allocation2 + $0x698] sm:$0xff] }
 0x18b   :  { %v889_v56 = vand.u32 2147483647, %v249_v52 }
 0x18c   :  { %v1506_v58 = vadd.f32 %v1505_v55, %v866_v51  ;;  %v250_v55 = vld [vmem:[#allocation2 + $0x6a0] sm:$0xff] }
 0x18d   :  { %v890_v59 = vand.u32 2147483647, %v250_v55 }
 0x18e   :  { %v1507_v61 = vadd.f32 %v1506_v58, %v867_v54  ;;  %v251_v58 = vld [vmem:[#allocation2 + $0x6a8] sm:$0xff] }
 0x18f   :  { %v891_v62 = vand.u32 2147483647, %v251_v58 }
 0x190   :  { %v1508_v0 = vadd.f32 %v1507_v61, %v868_v57  ;;  %v252_v61 = vld [vmem:[#allocation2 + $0x6b0] sm:$0xff] }
 0x191   :  { %v892_v1 = vand.u32 2147483647, %v252_v61 }
 0x192   :  { %v1509_v3 = vadd.f32 %v1508_v0, %v869_v60  ;;  %v253_v0 = vld [vmem:[#allocation2 + $0x6b8] sm:$0xff] }
 0x193   :  { %v893_v4 = vand.u32 2147483647, %v253_v0 }
 0x194   :  { %v1510_v6 = vadd.f32 %v1509_v3, %v870_v63  ;;  %v254_v3 = vld [vmem:[#allocation2 + $0x6c0] sm:$0xff] }
 0x195   :  { %v894_v7 = vand.u32 2147483647, %v254_v3 }
 0x196   :  { %v1511_v9 = vadd.f32 %v1510_v6, %v871_v2  ;;  %v255_v6 = vld [vmem:[#allocation2 + $0x6c8] sm:$0xff] }
 0x197   :  { %v895_v10 = vand.u32 2147483647, %v255_v6 }
 0x198   :  { %v1512_v12 = vadd.f32 %v1511_v9, %v872_v5  ;;  %v256_v9 = vld [vmem:[#allocation2 + $0x6d0] sm:$0xff] }
 0x199   :  { %v896_v13 = vand.u32 2147483647, %v256_v9 }
 0x19a   :  { %v1513_v15 = vadd.f32 %v1512_v12, %v873_v8  ;;  %v257_v12 = vld [vmem:[#allocation2 + $0x6d8] sm:$0xff] }
 0x19b   :  { %v897_v16 = vand.u32 2147483647, %v257_v12 }
 0x19c   :  { %v1514_v18 = vadd.f32 %v1513_v15, %v874_v11  ;;  %v258_v15 = vld [vmem:[#allocation2 + $0x6e0] sm:$0xff] }
 0x19d   :  { %v898_v19 = vand.u32 2147483647, %v258_v15 }
 0x19e   :  { %v1515_v21 = vadd.f32 %v1514_v18, %v875_v14  ;;  %v259_v18 = vld [vmem:[#allocation2 + $0x6e8] sm:$0xff] }
 0x19f   :  { %v899_v22 = vand.u32 2147483647, %v259_v18 }
 0x1a0   :  { %v1516_v24 = vadd.f32 %v1515_v21, %v876_v17  ;;  %v260_v21 = vld [vmem:[#allocation2 + $0x6f0] sm:$0xff] }
 0x1a1   :  { %v900_v25 = vand.u32 2147483647, %v260_v21 }
 0x1a2   :  { %v1517_v27 = vadd.f32 %v1516_v24, %v877_v20  ;;  %v261_v24 = vld [vmem:[#allocation2 + $0x6f8] sm:$0xff] }
 0x1a3   :  { %v901_v28 = vand.u32 2147483647, %v261_v24 }
 0x1a4   :  { %v1518_v30 = vadd.f32 %v1517_v27, %v878_v23  ;;  %v262_v27 = vld [vmem:[#allocation2 + $0x700] sm:$0xff] }
 0x1a5   :  { %v902_v31 = vand.u32 2147483647, %v262_v27 }
 0x1a6   :  { %v1519_v33 = vadd.f32 %v1518_v30, %v879_v26  ;;  %v263_v30 = vld [vmem:[#allocation2 + $0x708] sm:$0xff] }
 0x1a7   :  { %v903_v34 = vand.u32 2147483647, %v263_v30 }
 0x1a8   :  { %v1520_v36 = vadd.f32 %v1519_v33, %v880_v29  ;;  %v264_v33 = vld [vmem:[#allocation2 + $0x710] sm:$0xff] }
 0x1a9   :  { %v904_v37 = vand.u32 2147483647, %v264_v33 }
 0x1aa   :  { %v1521_v39 = vadd.f32 %v1520_v36, %v881_v32  ;;  %v265_v36 = vld [vmem:[#allocation2 + $0x718] sm:$0xff] }
 0x1ab   :  { %v905_v40 = vand.u32 2147483647, %v265_v36 }
 0x1ac   :  { %v1522_v42 = vadd.f32 %v1521_v39, %v882_v35  ;;  %v266_v39 = vld [vmem:[#allocation2 + $0x720] sm:$0xff] }
 0x1ad   :  { %v906_v43 = vand.u32 2147483647, %v266_v39 }
 0x1ae   :  { %v1523_v45 = vadd.f32 %v1522_v42, %v883_v38  ;;  %v267_v42 = vld [vmem:[#allocation2 + $0x728] sm:$0xff] }
 0x1af   :  { %v907_v46 = vand.u32 2147483647, %v267_v42 }
 0x1b0   :  { %v1524_v48 = vadd.f32 %v1523_v45, %v884_v41  ;;  %v268_v45 = vld [vmem:[#allocation2 + $0x730] sm:$0xff] }
 0x1b1   :  { %v908_v49 = vand.u32 2147483647, %v268_v45 }
 0x1b2   :  { %v1525_v51 = vadd.f32 %v1524_v48, %v885_v44  ;;  %v269_v48 = vld [vmem:[#allocation2 + $0x738] sm:$0xff] }
 0x1b3   :  { %v909_v52 = vand.u32 2147483647, %v269_v48 }
 0x1b4   :  { %v1526_v54 = vadd.f32 %v1525_v51, %v886_v47  ;;  %v270_v51 = vld [vmem:[#allocation2 + $0x740] sm:$0xff] }
 0x1b5   :  { %v910_v55 = vand.u32 2147483647, %v270_v51 }
 0x1b6   :  { %v1527_v57 = vadd.f32 %v1526_v54, %v887_v50  ;;  %v271_v54 = vld [vmem:[#allocation2 + $0x748] sm:$0xff] }
 0x1b7   :  { %v911_v58 = vand.u32 2147483647, %v271_v54 }
 0x1b8   :  { %v1528_v60 = vadd.f32 %v1527_v57, %v888_v53  ;;  %v272_v57 = vld [vmem:[#allocation2 + $0x750] sm:$0xff] }
 0x1b9   :  { %v912_v61 = vand.u32 2147483647, %v272_v57 }
 0x1ba   :  { %v1529_v63 = vadd.f32 %v1528_v60, %v889_v56  ;;  %v273_v60 = vld [vmem:[#allocation2 + $0x758] sm:$0xff] }
 0x1bb   :  { %v913_v0 = vand.u32 2147483647, %v273_v60 }
 0x1bc   :  { %v1530_v2 = vadd.f32 %v1529_v63, %v890_v59  ;;  %v274_v63 = vld [vmem:[#allocation2 + $0x760] sm:$0xff] }
 0x1bd   :  { %v914_v3 = vand.u32 2147483647, %v274_v63 }
 0x1be   :  { %v1531_v5 = vadd.f32 %v1530_v2, %v891_v62  ;;  %v275_v2 = vld [vmem:[#allocation2 + $0x768] sm:$0xff] }
 0x1bf   :  { %v915_v6 = vand.u32 2147483647, %v275_v2 }
 0x1c0   :  { %v1532_v8 = vadd.f32 %v1531_v5, %v892_v1  ;;  %v276_v5 = vld [vmem:[#allocation2 + $0x770] sm:$0xff] }
 0x1c1   :  { %v916_v9 = vand.u32 2147483647, %v276_v5 }
 0x1c2   :  { %v1533_v11 = vadd.f32 %v1532_v8, %v893_v4  ;;  %v277_v8 = vld [vmem:[#allocation2 + $0x778] sm:$0xff] }
 0x1c3   :  { %v917_v12 = vand.u32 2147483647, %v277_v8 }
 0x1c4   :  { %v1534_v14 = vadd.f32 %v1533_v11, %v894_v7  ;;  %v278_v11 = vld [vmem:[#allocation2 + $0x780] sm:$0xff] }
 0x1c5   :  { %v918_v15 = vand.u32 2147483647, %v278_v11 }
 0x1c6   :  { %v1535_v17 = vadd.f32 %v1534_v14, %v895_v10  ;;  %v279_v14 = vld [vmem:[#allocation2 + $0x788] sm:$0xff] }
 0x1c7   :  { %v919_v18 = vand.u32 2147483647, %v279_v14 }
 0x1c8   :  { %v1536_v20 = vadd.f32 %v1535_v17, %v896_v13  ;;  %v280_v17 = vld [vmem:[#allocation2 + $0x790] sm:$0xff] }
 0x1c9   :  { %v920_v21 = vand.u32 2147483647, %v280_v17 }
 0x1ca   :  { %v1537_v23 = vadd.f32 %v1536_v20, %v897_v16  ;;  %v281_v20 = vld [vmem:[#allocation2 + $0x798] sm:$0xff] }
 0x1cb   :  { %v921_v24 = vand.u32 2147483647, %v281_v20 }
 0x1cc   :  { %v1538_v26 = vadd.f32 %v1537_v23, %v898_v19  ;;  %v282_v23 = vld [vmem:[#allocation2 + $0x7a0] sm:$0xff] }
 0x1cd   :  { %v922_v27 = vand.u32 2147483647, %v282_v23 }
 0x1ce   :  { %v1539_v29 = vadd.f32 %v1538_v26, %v899_v22  ;;  %v283_v26 = vld [vmem:[#allocation2 + $0x7a8] sm:$0xff] }
 0x1cf   :  { %v923_v30 = vand.u32 2147483647, %v283_v26 }
 0x1d0   :  { %v1540_v32 = vadd.f32 %v1539_v29, %v900_v25  ;;  %v284_v29 = vld [vmem:[#allocation2 + $0x7b0] sm:$0xff] }
 0x1d1   :  { %v924_v33 = vand.u32 2147483647, %v284_v29 }
 0x1d2   :  { %v1541_v35 = vadd.f32 %v1540_v32, %v901_v28  ;;  %v285_v32 = vld [vmem:[#allocation2 + $0x7b8] sm:$0xff] }
 0x1d3   :  { %v925_v36 = vand.u32 2147483647, %v285_v32 }
 0x1d4   :  { %v1542_v38 = vadd.f32 %v1541_v35, %v902_v31  ;;  %v286_v35 = vld [vmem:[#allocation2 + $0x7c0] sm:$0xff] }
 0x1d5   :  { %v926_v39 = vand.u32 2147483647, %v286_v35 }
 0x1d6   :  { %v1543_v41 = vadd.f32 %v1542_v38, %v903_v34  ;;  %v287_v38 = vld [vmem:[#allocation2 + $0x7c8] sm:$0xff] }
 0x1d7   :  { %v927_v42 = vand.u32 2147483647, %v287_v38 }
 0x1d8   :  { %v1544_v44 = vadd.f32 %v1543_v41, %v904_v37  ;;  %v288_v41 = vld [vmem:[#allocation2 + $0x7d0] sm:$0xff] }
 0x1d9   :  { %v928_v45 = vand.u32 2147483647, %v288_v41 }
 0x1da   :  { %v1545_v47 = vadd.f32 %v1544_v44, %v905_v40  ;;  %v289_v44 = vld [vmem:[#allocation2 + $0x7d8] sm:$0xff] }
 0x1db   :  { %v929_v48 = vand.u32 2147483647, %v289_v44 }
 0x1dc   :  { %v1546_v50 = vadd.f32 %v1545_v47, %v906_v43  ;;  %v290_v47 = vld [vmem:[#allocation2 + $0x7e0] sm:$0xff] }
 0x1dd   :  { %v930_v51 = vand.u32 2147483647, %v290_v47 }
 0x1de   :  { %v1547_v53 = vadd.f32 %v1546_v50, %v907_v46  ;;  %v291_v50 = vld [vmem:[#allocation2 + $0x7e8] sm:$0xff] }
 0x1df   :  { %v931_v54 = vand.u32 2147483647, %v291_v50 }
 0x1e0   :  { %v1548_v56 = vadd.f32 %v1547_v53, %v908_v49  ;;  %v292_v53 = vld [vmem:[#allocation2 + $0x7f0] sm:$0xff] }
 0x1e1   :  { %v932_v57 = vand.u32 2147483647, %v292_v53 }
 0x1e2   :  { %v1549_v59 = vadd.f32 %v1548_v56, %v909_v52  ;;  %v293_v56 = vld [vmem:[#allocation2 + $0x7f8] sm:$0xff] }
 0x1e3   :  { %v933_v60 = vand.u32 2147483647, %v293_v56 }
 0x1e4   :  { %v1550_v62 = vadd.f32 %v1549_v59, %v910_v55  ;;  %v294_v59 = vld [vmem:[#allocation2 + $0x800] sm:$0xff] }
 0x1e5   :  { %v934_v63 = vand.u32 2147483647, %v294_v59 }
 0x1e6   :  { %v1551_v1 = vadd.f32 %v1550_v62, %v911_v58  ;;  %v295_v62 = vld [vmem:[#allocation2 + $0x808] sm:$0xff] }
 0x1e7   :  { %v935_v2 = vand.u32 2147483647, %v295_v62 }
 0x1e8   :  { %v1552_v4 = vadd.f32 %v1551_v1, %v912_v61  ;;  %v296_v1 = vld [vmem:[#allocation2 + $0x810] sm:$0xff] }
 0x1e9   :  { %v936_v5 = vand.u32 2147483647, %v296_v1 }
 0x1ea   :  { %v1553_v7 = vadd.f32 %v1552_v4, %v913_v0  ;;  %v297_v4 = vld [vmem:[#allocation2 + $0x818] sm:$0xff] }
 0x1eb   :  { %v937_v8 = vand.u32 2147483647, %v297_v4 }
 0x1ec   :  { %v1554_v10 = vadd.f32 %v1553_v7, %v914_v3  ;;  %v298_v7 = vld [vmem:[#allocation2 + $0x820] sm:$0xff] }
 0x1ed   :  { %v938_v11 = vand.u32 2147483647, %v298_v7 }
 0x1ee   :  { %v1555_v13 = vadd.f32 %v1554_v10, %v915_v6  ;;  %v299_v10 = vld [vmem:[#allocation2 + $0x828] sm:$0xff] }
 0x1ef   :  { %v939_v14 = vand.u32 2147483647, %v299_v10 }
 0x1f0   :  { %v1556_v16 = vadd.f32 %v1555_v13, %v916_v9  ;;  %v300_v13 = vld [vmem:[#allocation2 + $0x830] sm:$0xff] }
 0x1f1   :  { %v940_v17 = vand.u32 2147483647, %v300_v13 }
 0x1f2   :  { %v1557_v19 = vadd.f32 %v1556_v16, %v917_v12  ;;  %v301_v16 = vld [vmem:[#allocation2 + $0x838] sm:$0xff] }
 0x1f3   :  { %v941_v20 = vand.u32 2147483647, %v301_v16 }
 0x1f4   :  { %v1558_v22 = vadd.f32 %v1557_v19, %v918_v15  ;;  %v302_v19 = vld [vmem:[#allocation2 + $0x840] sm:$0xff] }
 0x1f5   :  { %v942_v23 = vand.u32 2147483647, %v302_v19 }
 0x1f6   :  { %v1559_v25 = vadd.f32 %v1558_v22, %v919_v18  ;;  %v303_v22 = vld [vmem:[#allocation2 + $0x848] sm:$0xff] }
 0x1f7   :  { %v943_v26 = vand.u32 2147483647, %v303_v22 }
 0x1f8   :  { %v1560_v28 = vadd.f32 %v1559_v25, %v920_v21  ;;  %v304_v25 = vld [vmem:[#allocation2 + $0x850] sm:$0xff] }
 0x1f9   :  { %v944_v29 = vand.u32 2147483647, %v304_v25 }
 0x1fa   :  { %v1561_v31 = vadd.f32 %v1560_v28, %v921_v24  ;;  %v305_v28 = vld [vmem:[#allocation2 + $0x858] sm:$0xff] }
 0x1fb   :  { %v945_v32 = vand.u32 2147483647, %v305_v28 }
 0x1fc   :  { %v1562_v34 = vadd.f32 %v1561_v31, %v922_v27  ;;  %v306_v31 = vld [vmem:[#allocation2 + $0x860] sm:$0xff] }
 0x1fd   :  { %v946_v35 = vand.u32 2147483647, %v306_v31 }
 0x1fe   :  { %v1563_v37 = vadd.f32 %v1562_v34, %v923_v30  ;;  %v307_v34 = vld [vmem:[#allocation2 + $0x868] sm:$0xff] }
 0x1ff   :  { %v947_v38 = vand.u32 2147483647, %v307_v34 }
 0x200   :  { %v1564_v40 = vadd.f32 %v1563_v37, %v924_v33  ;;  %v308_v37 = vld [vmem:[#allocation2 + $0x870] sm:$0xff] }
 0x201   :  { %v948_v41 = vand.u32 2147483647, %v308_v37 }
 0x202   :  { %v1565_v43 = vadd.f32 %v1564_v40, %v925_v36  ;;  %v309_v40 = vld [vmem:[#allocation2 + $0x878] sm:$0xff] }
 0x203   :  { %v949_v44 = vand.u32 2147483647, %v309_v40 }
 0x204   :  { %v1566_v46 = vadd.f32 %v1565_v43, %v926_v39  ;;  %v310_v43 = vld [vmem:[#allocation2 + $0x880] sm:$0xff] }
 0x205   :  { %v950_v47 = vand.u32 2147483647, %v310_v43 }
 0x206   :  { %v1567_v49 = vadd.f32 %v1566_v46, %v927_v42  ;;  %v311_v46 = vld [vmem:[#allocation2 + $0x888] sm:$0xff] }
 0x207   :  { %v951_v50 = vand.u32 2147483647, %v311_v46 }
 0x208   :  { %v1568_v52 = vadd.f32 %v1567_v49, %v928_v45  ;;  %v312_v49 = vld [vmem:[#allocation2 + $0x890] sm:$0xff] }
 0x209   :  { %v952_v53 = vand.u32 2147483647, %v312_v49 }
 0x20a   :  { %v1569_v55 = vadd.f32 %v1568_v52, %v929_v48  ;;  %v313_v52 = vld [vmem:[#allocation2 + $0x898] sm:$0xff] }
 0x20b   :  { %v953_v56 = vand.u32 2147483647, %v313_v52 }
 0x20c   :  { %v1570_v58 = vadd.f32 %v1569_v55, %v930_v51  ;;  %v314_v55 = vld [vmem:[#allocation2 + $0x8a0] sm:$0xff] }
 0x20d   :  { %v954_v59 = vand.u32 2147483647, %v314_v55 }
 0x20e   :  { %v1571_v61 = vadd.f32 %v1570_v58, %v931_v54  ;;  %v315_v58 = vld [vmem:[#allocation2 + $0x8a8] sm:$0xff] }
 0x20f   :  { %v955_v62 = vand.u32 2147483647, %v315_v58 }
 0x210   :  { %v1572_v0 = vadd.f32 %v1571_v61, %v932_v57  ;;  %v316_v61 = vld [vmem:[#allocation2 + $0x8b0] sm:$0xff] }
 0x211   :  { %v956_v1 = vand.u32 2147483647, %v316_v61 }
 0x212   :  { %v1573_v3 = vadd.f32 %v1572_v0, %v933_v60  ;;  %v317_v0 = vld [vmem:[#allocation2 + $0x8b8] sm:$0xff] }
 0x213   :  { %v957_v4 = vand.u32 2147483647, %v317_v0 }
 0x214   :  { %v1574_v6 = vadd.f32 %v1573_v3, %v934_v63  ;;  %v318_v3 = vld [vmem:[#allocation2 + $0x8c0] sm:$0xff] }
 0x215   :  { %v958_v7 = vand.u32 2147483647, %v318_v3 }
 0x216   :  { %v1575_v9 = vadd.f32 %v1574_v6, %v935_v2  ;;  %v319_v6 = vld [vmem:[#allocation2 + $0x8c8] sm:$0xff] }
 0x217   :  { %v959_v10 = vand.u32 2147483647, %v319_v6 }
 0x218   :  { %v1576_v12 = vadd.f32 %v1575_v9, %v936_v5  ;;  %v320_v9 = vld [vmem:[#allocation2 + $0x8d0] sm:$0xff] }
 0x219   :  { %v960_v13 = vand.u32 2147483647, %v320_v9 }
 0x21a   :  { %v1577_v15 = vadd.f32 %v1576_v12, %v937_v8  ;;  %v321_v12 = vld [vmem:[#allocation2 + $0x8d8] sm:$0xff] }
 0x21b   :  { %v961_v16 = vand.u32 2147483647, %v321_v12 }
 0x21c   :  { %v1578_v18 = vadd.f32 %v1577_v15, %v938_v11  ;;  %v322_v15 = vld [vmem:[#allocation2 + $0x8e0] sm:$0xff] }
 0x21d   :  { %v962_v19 = vand.u32 2147483647, %v322_v15 }
 0x21e   :  { %v1579_v21 = vadd.f32 %v1578_v18, %v939_v14  ;;  %v323_v18 = vld [vmem:[#allocation2 + $0x8e8] sm:$0xff] }
 0x21f   :  { %v963_v22 = vand.u32 2147483647, %v323_v18 }
 0x220   :  { %v1580_v24 = vadd.f32 %v1579_v21, %v940_v17  ;;  %v324_v21 = vld [vmem:[#allocation2 + $0x8f0] sm:$0xff] }
 0x221   :  { %v964_v25 = vand.u32 2147483647, %v324_v21 }
 0x222   :  { %v1581_v27 = vadd.f32 %v1580_v24, %v941_v20  ;;  %v325_v24 = vld [vmem:[#allocation2 + $0x8f8] sm:$0xff] }
 0x223   :  { %v965_v28 = vand.u32 2147483647, %v325_v24 }
 0x224   :  { %v1582_v30 = vadd.f32 %v1581_v27, %v942_v23  ;;  %v326_v27 = vld [vmem:[#allocation2 + $0x900] sm:$0xff] }
 0x225   :  { %v966_v31 = vand.u32 2147483647, %v326_v27 }
 0x226   :  { %v1583_v33 = vadd.f32 %v1582_v30, %v943_v26  ;;  %v327_v30 = vld [vmem:[#allocation2 + $0x908] sm:$0xff] }
 0x227   :  { %v967_v34 = vand.u32 2147483647, %v327_v30 }
 0x228   :  { %v1584_v36 = vadd.f32 %v1583_v33, %v944_v29  ;;  %v328_v33 = vld [vmem:[#allocation2 + $0x910] sm:$0xff] }
 0x229   :  { %v968_v37 = vand.u32 2147483647, %v328_v33 }
 0x22a   :  { %v1585_v39 = vadd.f32 %v1584_v36, %v945_v32  ;;  %v329_v36 = vld [vmem:[#allocation2 + $0x918] sm:$0xff] }
 0x22b   :  { %v969_v40 = vand.u32 2147483647, %v329_v36 }
 0x22c   :  { %v1586_v42 = vadd.f32 %v1585_v39, %v946_v35  ;;  %v330_v39 = vld [vmem:[#allocation2 + $0x920] sm:$0xff] }
 0x22d   :  { %v970_v43 = vand.u32 2147483647, %v330_v39 }
 0x22e   :  { %v1587_v45 = vadd.f32 %v1586_v42, %v947_v38  ;;  %v331_v42 = vld [vmem:[#allocation2 + $0x928] sm:$0xff] }
 0x22f   :  { %v971_v46 = vand.u32 2147483647, %v331_v42 }
 0x230   :  { %v1588_v48 = vadd.f32 %v1587_v45, %v948_v41  ;;  %v332_v45 = vld [vmem:[#allocation2 + $0x930] sm:$0xff] }
 0x231   :  { %v972_v49 = vand.u32 2147483647, %v332_v45 }
 0x232   :  { %v1589_v51 = vadd.f32 %v1588_v48, %v949_v44  ;;  %v333_v48 = vld [vmem:[#allocation2 + $0x938] sm:$0xff] }
 0x233   :  { %v973_v52 = vand.u32 2147483647, %v333_v48 }
 0x234   :  { %v1590_v54 = vadd.f32 %v1589_v51, %v950_v47  ;;  %v334_v51 = vld [vmem:[#allocation2 + $0x940] sm:$0xff] }
 0x235   :  { %v974_v55 = vand.u32 2147483647, %v334_v51 }
 0x236   :  { %v1591_v57 = vadd.f32 %v1590_v54, %v951_v50  ;;  %v335_v54 = vld [vmem:[#allocation2 + $0x948] sm:$0xff] }
 0x237   :  { %v975_v58 = vand.u32 2147483647, %v335_v54 }
 0x238   :  { %v1592_v60 = vadd.f32 %v1591_v57, %v952_v53  ;;  %v336_v57 = vld [vmem:[#allocation2 + $0x950] sm:$0xff] }
 0x239   :  { %v976_v61 = vand.u32 2147483647, %v336_v57 }
 0x23a   :  { %v1593_v63 = vadd.f32 %v1592_v60, %v953_v56  ;;  %v337_v60 = vld [vmem:[#allocation2 + $0x958] sm:$0xff] }
 0x23b   :  { %v977_v0 = vand.u32 2147483647, %v337_v60 }
 0x23c   :  { %v1594_v2 = vadd.f32 %v1593_v63, %v954_v59  ;;  %v338_v63 = vld [vmem:[#allocation2 + $0x960] sm:$0xff] }
 0x23d   :  { %v978_v3 = vand.u32 2147483647, %v338_v63 }
 0x23e   :  { %v1595_v5 = vadd.f32 %v1594_v2, %v955_v62  ;;  %v339_v2 = vld [vmem:[#allocation2 + $0x968] sm:$0xff] }
 0x23f   :  { %v979_v6 = vand.u32 2147483647, %v339_v2 }
 0x240   :  { %v1596_v8 = vadd.f32 %v1595_v5, %v956_v1  ;;  %v340_v5 = vld [vmem:[#allocation2 + $0x970] sm:$0xff] }
 0x241   :  { %v980_v9 = vand.u32 2147483647, %v340_v5 }
 0x242   :  { %v1597_v11 = vadd.f32 %v1596_v8, %v957_v4  ;;  %v341_v8 = vld [vmem:[#allocation2 + $0x978] sm:$0xff] }
 0x243   :  { %v981_v12 = vand.u32 2147483647, %v341_v8 }
 0x244   :  { %v1598_v14 = vadd.f32 %v1597_v11, %v958_v7  ;;  %v342_v11 = vld [vmem:[#allocation2 + $0x980] sm:$0xff] }
 0x245   :  { %v982_v15 = vand.u32 2147483647, %v342_v11 }
 0x246   :  { %v1599_v17 = vadd.f32 %v1598_v14, %v959_v10  ;;  %v343_v14 = vld [vmem:[#allocation2 + $0x988] sm:$0xff] }
 0x247   :  { %v983_v18 = vand.u32 2147483647, %v343_v14 }
 0x248   :  { %v1600_v20 = vadd.f32 %v1599_v17, %v960_v13  ;;  %v344_v17 = vld [vmem:[#allocation2 + $0x990] sm:$0xff] }
 0x249   :  { %v984_v21 = vand.u32 2147483647, %v344_v17 }
 0x24a   :  { %v1601_v23 = vadd.f32 %v1600_v20, %v961_v16  ;;  %v345_v20 = vld [vmem:[#allocation2 + $0x998] sm:$0xff] }
 0x24b   :  { %v985_v24 = vand.u32 2147483647, %v345_v20 }
 0x24c   :  { %v1602_v26 = vadd.f32 %v1601_v23, %v962_v19  ;;  %v346_v23 = vld [vmem:[#allocation2 + $0x9a0] sm:$0xff] }
 0x24d   :  { %v986_v27 = vand.u32 2147483647, %v346_v23 }
 0x24e   :  { %v1603_v29 = vadd.f32 %v1602_v26, %v963_v22  ;;  %v347_v26 = vld [vmem:[#allocation2 + $0x9a8] sm:$0xff] }
 0x24f   :  { %v987_v30 = vand.u32 2147483647, %v347_v26 }
 0x250   :  { %v1604_v32 = vadd.f32 %v1603_v29, %v964_v25  ;;  %v348_v29 = vld [vmem:[#allocation2 + $0x9b0] sm:$0xff] }
 0x251   :  { %v988_v33 = vand.u32 2147483647, %v348_v29 }
 0x252   :  { %v1605_v35 = vadd.f32 %v1604_v32, %v965_v28  ;;  %v349_v32 = vld [vmem:[#allocation2 + $0x9b8] sm:$0xff] }
 0x253   :  { %v989_v36 = vand.u32 2147483647, %v349_v32 }
 0x254   :  { %v1606_v38 = vadd.f32 %v1605_v35, %v966_v31  ;;  %v350_v35 = vld [vmem:[#allocation2 + $0x9c0] sm:$0xff] }
 0x255   :  { %v990_v39 = vand.u32 2147483647, %v350_v35 }
 0x256   :  { %v1607_v41 = vadd.f32 %v1606_v38, %v967_v34  ;;  %v351_v38 = vld [vmem:[#allocation2 + $0x9c8] sm:$0xff] }
 0x257   :  { %v991_v42 = vand.u32 2147483647, %v351_v38 }
 0x258   :  { %v1608_v44 = vadd.f32 %v1607_v41, %v968_v37  ;;  %v352_v41 = vld [vmem:[#allocation2 + $0x9d0] sm:$0xff] }
 0x259   :  { %v992_v45 = vand.u32 2147483647, %v352_v41 }
 0x25a   :  { %v1609_v47 = vadd.f32 %v1608_v44, %v969_v40  ;;  %v353_v44 = vld [vmem:[#allocation2 + $0x9d8] sm:$0xff] }
 0x25b   :  { %v993_v48 = vand.u32 2147483647, %v353_v44 }
 0x25c   :  { %v1610_v50 = vadd.f32 %v1609_v47, %v970_v43  ;;  %v354_v47 = vld [vmem:[#allocation2 + $0x9e0] sm:$0xff] }
 0x25d   :  { %v994_v51 = vand.u32 2147483647, %v354_v47 }
 0x25e   :  { %v1611_v53 = vadd.f32 %v1610_v50, %v971_v46  ;;  %v355_v50 = vld [vmem:[#allocation2 + $0x9e8] sm:$0xff] }
 0x25f   :  { %v995_v54 = vand.u32 2147483647, %v355_v50 }
 0x260   :  { %v1612_v56 = vadd.f32 %v1611_v53, %v972_v49  ;;  %v356_v53 = vld [vmem:[#allocation2 + $0x9f0] sm:$0xff] }
 0x261   :  { %v996_v57 = vand.u32 2147483647, %v356_v53 }
 0x262   :  { %v1613_v59 = vadd.f32 %v1612_v56, %v973_v52  ;;  %v357_v56 = vld [vmem:[#allocation2 + $0x9f8] sm:$0xff] }
 0x263   :  { %v997_v60 = vand.u32 2147483647, %v357_v56 }
 0x264   :  { %v1614_v62 = vadd.f32 %v1613_v59, %v974_v55  ;;  %v358_v59 = vld [vmem:[#allocation2 + $0xa00] sm:$0xff] }
 0x265   :  { %v998_v63 = vand.u32 2147483647, %v358_v59 }
 0x266   :  { %v1615_v1 = vadd.f32 %v1614_v62, %v975_v58  ;;  %v359_v62 = vld [vmem:[#allocation2 + $0xa08] sm:$0xff] }
 0x267   :  { %v999_v2 = vand.u32 2147483647, %v359_v62 }
 0x268   :  { %v1616_v4 = vadd.f32 %v1615_v1, %v976_v61  ;;  %v360_v1 = vld [vmem:[#allocation2 + $0xa10] sm:$0xff] }
 0x269   :  { %v1000_v5 = vand.u32 2147483647, %v360_v1 }
 0x26a   :  { %v1617_v7 = vadd.f32 %v1616_v4, %v977_v0  ;;  %v361_v4 = vld [vmem:[#allocation2 + $0xa18] sm:$0xff] }
 0x26b   :  { %v1001_v8 = vand.u32 2147483647, %v361_v4 }
 0x26c   :  { %v1618_v10 = vadd.f32 %v1617_v7, %v978_v3  ;;  %v362_v7 = vld [vmem:[#allocation2 + $0xa20] sm:$0xff] }
 0x26d   :  { %v1002_v11 = vand.u32 2147483647, %v362_v7 }
 0x26e   :  { %v1619_v13 = vadd.f32 %v1618_v10, %v979_v6  ;;  %v363_v10 = vld [vmem:[#allocation2 + $0xa28] sm:$0xff] }
 0x26f   :  { %v1003_v14 = vand.u32 2147483647, %v363_v10 }
 0x270   :  { %v1620_v16 = vadd.f32 %v1619_v13, %v980_v9  ;;  %v364_v13 = vld [vmem:[#allocation2 + $0xa30] sm:$0xff] }
 0x271   :  { %v1004_v17 = vand.u32 2147483647, %v364_v13 }
 0x272   :  { %v1621_v19 = vadd.f32 %v1620_v16, %v981_v12  ;;  %v365_v16 = vld [vmem:[#allocation2 + $0xa38] sm:$0xff] }
 0x273   :  { %v1005_v20 = vand.u32 2147483647, %v365_v16 }
 0x274   :  { %v1622_v22 = vadd.f32 %v1621_v19, %v982_v15  ;;  %v366_v19 = vld [vmem:[#allocation2 + $0xa40] sm:$0xff] }
 0x275   :  { %v1006_v23 = vand.u32 2147483647, %v366_v19 }
 0x276   :  { %v1623_v25 = vadd.f32 %v1622_v22, %v983_v18  ;;  %v367_v22 = vld [vmem:[#allocation2 + $0xa48] sm:$0xff] }
 0x277   :  { %v1007_v26 = vand.u32 2147483647, %v367_v22 }
 0x278   :  { %v1624_v28 = vadd.f32 %v1623_v25, %v984_v21  ;;  %v368_v25 = vld [vmem:[#allocation2 + $0xa50] sm:$0xff] }
 0x279   :  { %v1008_v29 = vand.u32 2147483647, %v368_v25 }
 0x27a   :  { %v1625_v31 = vadd.f32 %v1624_v28, %v985_v24  ;;  %v369_v28 = vld [vmem:[#allocation2 + $0xa58] sm:$0xff] }
 0x27b   :  { %v1009_v32 = vand.u32 2147483647, %v369_v28 }
 0x27c   :  { %v1626_v34 = vadd.f32 %v1625_v31, %v986_v27  ;;  %v370_v31 = vld [vmem:[#allocation2 + $0xa60] sm:$0xff] }
 0x27d   :  { %v1010_v35 = vand.u32 2147483647, %v370_v31 }
 0x27e   :  { %v1627_v37 = vadd.f32 %v1626_v34, %v987_v30  ;;  %v371_v34 = vld [vmem:[#allocation2 + $0xa68] sm:$0xff] }
 0x27f   :  { %v1011_v38 = vand.u32 2147483647, %v371_v34 }
 0x280   :  { %v1628_v40 = vadd.f32 %v1627_v37, %v988_v33  ;;  %v372_v37 = vld [vmem:[#allocation2 + $0xa70] sm:$0xff] }
 0x281   :  { %v1012_v41 = vand.u32 2147483647, %v372_v37 }
 0x282   :  { %v1629_v43 = vadd.f32 %v1628_v40, %v989_v36  ;;  %v373_v40 = vld [vmem:[#allocation2 + $0xa78] sm:$0xff] }
 0x283   :  { %v1013_v44 = vand.u32 2147483647, %v373_v40 }
 0x284   :  { %v1630_v46 = vadd.f32 %v1629_v43, %v990_v39  ;;  %v374_v43 = vld [vmem:[#allocation2 + $0xa80] sm:$0xff] }
 0x285   :  { %v1014_v47 = vand.u32 2147483647, %v374_v43 }
 0x286   :  { %v1631_v49 = vadd.f32 %v1630_v46, %v991_v42  ;;  %v375_v46 = vld [vmem:[#allocation2 + $0xa88] sm:$0xff] }
 0x287   :  { %v1015_v50 = vand.u32 2147483647, %v375_v46 }
 0x288   :  { %v1632_v52 = vadd.f32 %v1631_v49, %v992_v45  ;;  %v376_v49 = vld [vmem:[#allocation2 + $0xa90] sm:$0xff] }
 0x289   :  { %v1016_v53 = vand.u32 2147483647, %v376_v49 }
 0x28a   :  { %v1633_v55 = vadd.f32 %v1632_v52, %v993_v48  ;;  %v377_v52 = vld [vmem:[#allocation2 + $0xa98] sm:$0xff] }
 0x28b   :  { %v1017_v56 = vand.u32 2147483647, %v377_v52 }
 0x28c   :  { %v1634_v58 = vadd.f32 %v1633_v55, %v994_v51  ;;  %v378_v55 = vld [vmem:[#allocation2 + $0xaa0] sm:$0xff] }
 0x28d   :  { %v1018_v59 = vand.u32 2147483647, %v378_v55 }
 0x28e   :  { %v1635_v61 = vadd.f32 %v1634_v58, %v995_v54  ;;  %v379_v58 = vld [vmem:[#allocation2 + $0xaa8] sm:$0xff] }
 0x28f   :  { %v1019_v62 = vand.u32 2147483647, %v379_v58 }
 0x290   :  { %v1636_v0 = vadd.f32 %v1635_v61, %v996_v57  ;;  %v380_v61 = vld [vmem:[#allocation2 + $0xab0] sm:$0xff] }
 0x291   :  { %v1020_v1 = vand.u32 2147483647, %v380_v61 }
 0x292   :  { %v1637_v3 = vadd.f32 %v1636_v0, %v997_v60  ;;  %v381_v0 = vld [vmem:[#allocation2 + $0xab8] sm:$0xff] }
 0x293   :  { %v1021_v4 = vand.u32 2147483647, %v381_v0 }
 0x294   :  { %v1638_v6 = vadd.f32 %v1637_v3, %v998_v63  ;;  %v382_v3 = vld [vmem:[#allocation2 + $0xac0] sm:$0xff] }
 0x295   :  { %v1022_v7 = vand.u32 2147483647, %v382_v3 }
 0x296   :  { %v1639_v9 = vadd.f32 %v1638_v6, %v999_v2  ;;  %v383_v6 = vld [vmem:[#allocation2 + $0xac8] sm:$0xff] }
 0x297   :  { %v1023_v10 = vand.u32 2147483647, %v383_v6 }
 0x298   :  { %v1640_v12 = vadd.f32 %v1639_v9, %v1000_v5  ;;  %v384_v9 = vld [vmem:[#allocation2 + $0xad0] sm:$0xff] }
 0x299   :  { %v1024_v13 = vand.u32 2147483647, %v384_v9 }
 0x29a   :  { %v1641_v15 = vadd.f32 %v1640_v12, %v1001_v8  ;;  %v385_v12 = vld [vmem:[#allocation2 + $0xad8] sm:$0xff] }
 0x29b   :  { %v1025_v16 = vand.u32 2147483647, %v385_v12 }
 0x29c   :  { %v1642_v18 = vadd.f32 %v1641_v15, %v1002_v11  ;;  %v386_v15 = vld [vmem:[#allocation2 + $0xae0] sm:$0xff] }
 0x29d   :  { %v1026_v19 = vand.u32 2147483647, %v386_v15 }
 0x29e   :  { %v1643_v21 = vadd.f32 %v1642_v18, %v1003_v14  ;;  %v387_v18 = vld [vmem:[#allocation2 + $0xae8] sm:$0xff] }
 0x29f   :  { %v1027_v22 = vand.u32 2147483647, %v387_v18 }
 0x2a0   :  { %v1644_v24 = vadd.f32 %v1643_v21, %v1004_v17  ;;  %v388_v21 = vld [vmem:[#allocation2 + $0xaf0] sm:$0xff] }
 0x2a1   :  { %v1028_v25 = vand.u32 2147483647, %v388_v21 }
 0x2a2   :  { %v1645_v27 = vadd.f32 %v1644_v24, %v1005_v20  ;;  %v389_v24 = vld [vmem:[#allocation2 + $0xaf8] sm:$0xff] }
 0x2a3   :  { %v1029_v28 = vand.u32 2147483647, %v389_v24 }
 0x2a4   :  { %v1646_v30 = vadd.f32 %v1645_v27, %v1006_v23  ;;  %v390_v27 = vld [vmem:[#allocation2 + $0xb00] sm:$0xff] }
 0x2a5   :  { %v1030_v31 = vand.u32 2147483647, %v390_v27 }
 0x2a6   :  { %v1647_v33 = vadd.f32 %v1646_v30, %v1007_v26  ;;  %v391_v30 = vld [vmem:[#allocation2 + $0xb08] sm:$0xff] }
 0x2a7   :  { %v1031_v34 = vand.u32 2147483647, %v391_v30 }
 0x2a8   :  { %v1648_v36 = vadd.f32 %v1647_v33, %v1008_v29  ;;  %v392_v33 = vld [vmem:[#allocation2 + $0xb10] sm:$0xff] }
 0x2a9   :  { %v1032_v37 = vand.u32 2147483647, %v392_v33 }
 0x2aa   :  { %v1649_v39 = vadd.f32 %v1648_v36, %v1009_v32  ;;  %v393_v36 = vld [vmem:[#allocation2 + $0xb18] sm:$0xff] }
 0x2ab   :  { %v1033_v40 = vand.u32 2147483647, %v393_v36 }
 0x2ac   :  { %v1650_v42 = vadd.f32 %v1649_v39, %v1010_v35  ;;  %v394_v39 = vld [vmem:[#allocation2 + $0xb20] sm:$0xff] }
 0x2ad   :  { %v1034_v43 = vand.u32 2147483647, %v394_v39 }
 0x2ae   :  { %v1651_v45 = vadd.f32 %v1650_v42, %v1011_v38  ;;  %v395_v42 = vld [vmem:[#allocation2 + $0xb28] sm:$0xff] }
 0x2af   :  { %v1035_v46 = vand.u32 2147483647, %v395_v42 }
 0x2b0   :  { %v1652_v48 = vadd.f32 %v1651_v45, %v1012_v41  ;;  %v396_v45 = vld [vmem:[#allocation2 + $0xb30] sm:$0xff] }
 0x2b1   :  { %v1036_v49 = vand.u32 2147483647, %v396_v45 }
 0x2b2   :  { %v1653_v51 = vadd.f32 %v1652_v48, %v1013_v44  ;;  %v397_v48 = vld [vmem:[#allocation2 + $0xb38] sm:$0xff] }
 0x2b3   :  { %v1037_v52 = vand.u32 2147483647, %v397_v48 }
 0x2b4   :  { %v1654_v54 = vadd.f32 %v1653_v51, %v1014_v47  ;;  %v398_v51 = vld [vmem:[#allocation2 + $0xb40] sm:$0xff] }
 0x2b5   :  { %v1038_v55 = vand.u32 2147483647, %v398_v51 }
 0x2b6   :  { %v1655_v57 = vadd.f32 %v1654_v54, %v1015_v50  ;;  %v399_v54 = vld [vmem:[#allocation2 + $0xb48] sm:$0xff] }
 0x2b7   :  { %v1039_v58 = vand.u32 2147483647, %v399_v54 }
 0x2b8   :  { %v1656_v60 = vadd.f32 %v1655_v57, %v1016_v53  ;;  %v400_v57 = vld [vmem:[#allocation2 + $0xb50] sm:$0xff] }
 0x2b9   :  { %v1040_v61 = vand.u32 2147483647, %v400_v57 }
 0x2ba   :  { %v1657_v63 = vadd.f32 %v1656_v60, %v1017_v56  ;;  %v401_v60 = vld [vmem:[#allocation2 + $0xb58] sm:$0xff] }
 0x2bb   :  { %v1041_v0 = vand.u32 2147483647, %v401_v60 }
 0x2bc   :  { %v1658_v2 = vadd.f32 %v1657_v63, %v1018_v59  ;;  %v402_v63 = vld [vmem:[#allocation2 + $0xb60] sm:$0xff] }
 0x2bd   :  { %v1042_v3 = vand.u32 2147483647, %v402_v63 }
 0x2be   :  { %v1659_v5 = vadd.f32 %v1658_v2, %v1019_v62  ;;  %v403_v2 = vld [vmem:[#allocation2 + $0xb68] sm:$0xff] }
 0x2bf   :  { %v1043_v6 = vand.u32 2147483647, %v403_v2 }
 0x2c0   :  { %v1660_v8 = vadd.f32 %v1659_v5, %v1020_v1  ;;  %v404_v5 = vld [vmem:[#allocation2 + $0xb70] sm:$0xff] }
 0x2c1   :  { %v1044_v9 = vand.u32 2147483647, %v404_v5 }
 0x2c2   :  { %v1661_v11 = vadd.f32 %v1660_v8, %v1021_v4  ;;  %v405_v8 = vld [vmem:[#allocation2 + $0xb78] sm:$0xff] }
 0x2c3   :  { %v1045_v12 = vand.u32 2147483647, %v405_v8 }
 0x2c4   :  { %v1662_v14 = vadd.f32 %v1661_v11, %v1022_v7  ;;  %v406_v11 = vld [vmem:[#allocation2 + $0xb80] sm:$0xff] }
 0x2c5   :  { %v1046_v15 = vand.u32 2147483647, %v406_v11 }
 0x2c6   :  { %v1663_v17 = vadd.f32 %v1662_v14, %v1023_v10  ;;  %v407_v14 = vld [vmem:[#allocation2 + $0xb88] sm:$0xff] }
 0x2c7   :  { %v1047_v18 = vand.u32 2147483647, %v407_v14 }
 0x2c8   :  { %v1664_v20 = vadd.f32 %v1663_v17, %v1024_v13  ;;  %v408_v17 = vld [vmem:[#allocation2 + $0xb90] sm:$0xff] }
 0x2c9   :  { %v1048_v21 = vand.u32 2147483647, %v408_v17 }
 0x2ca   :  { %v1665_v23 = vadd.f32 %v1664_v20, %v1025_v16  ;;  %v409_v20 = vld [vmem:[#allocation2 + $0xb98] sm:$0xff] }
 0x2cb   :  { %v1049_v24 = vand.u32 2147483647, %v409_v20 }
 0x2cc   :  { %v1666_v26 = vadd.f32 %v1665_v23, %v1026_v19  ;;  %v410_v23 = vld [vmem:[#allocation2 + $0xba0] sm:$0xff] }
 0x2cd   :  { %v1050_v27 = vand.u32 2147483647, %v410_v23 }
 0x2ce   :  { %v1667_v29 = vadd.f32 %v1666_v26, %v1027_v22  ;;  %v411_v26 = vld [vmem:[#allocation2 + $0xba8] sm:$0xff] }
 0x2cf   :  { %v1051_v30 = vand.u32 2147483647, %v411_v26 }
 0x2d0   :  { %v1668_v32 = vadd.f32 %v1667_v29, %v1028_v25  ;;  %v412_v29 = vld [vmem:[#allocation2 + $0xbb0] sm:$0xff] }
 0x2d1   :  { %v1052_v33 = vand.u32 2147483647, %v412_v29 }
 0x2d2   :  { %v1669_v35 = vadd.f32 %v1668_v32, %v1029_v28  ;;  %v413_v32 = vld [vmem:[#allocation2 + $0xbb8] sm:$0xff] }
 0x2d3   :  { %v1053_v36 = vand.u32 2147483647, %v413_v32 }
 0x2d4   :  { %v1670_v38 = vadd.f32 %v1669_v35, %v1030_v31  ;;  %v414_v35 = vld [vmem:[#allocation2 + $0xbc0] sm:$0xff] }
 0x2d5   :  { %v1054_v39 = vand.u32 2147483647, %v414_v35 }
 0x2d6   :  { %v1671_v41 = vadd.f32 %v1670_v38, %v1031_v34  ;;  %v415_v38 = vld [vmem:[#allocation2 + $0xbc8] sm:$0xff] }
 0x2d7   :  { %v1055_v42 = vand.u32 2147483647, %v415_v38 }
 0x2d8   :  { %v1672_v44 = vadd.f32 %v1671_v41, %v1032_v37  ;;  %v416_v41 = vld [vmem:[#allocation2 + $0xbd0] sm:$0xff] }
 0x2d9   :  { %v1056_v45 = vand.u32 2147483647, %v416_v41 }
 0x2da   :  { %v1673_v47 = vadd.f32 %v1672_v44, %v1033_v40  ;;  %v417_v44 = vld [vmem:[#allocation2 + $0xbd8] sm:$0xff] }
 0x2db   :  { %v1057_v48 = vand.u32 2147483647, %v417_v44 }
 0x2dc   :  { %v1674_v50 = vadd.f32 %v1673_v47, %v1034_v43  ;;  %v418_v47 = vld [vmem:[#allocation2 + $0xbe0] sm:$0xff] }
 0x2dd   :  { %v1058_v51 = vand.u32 2147483647, %v418_v47 }
 0x2de   :  { %v1675_v53 = vadd.f32 %v1674_v50, %v1035_v46  ;;  %v419_v50 = vld [vmem:[#allocation2 + $0xbe8] sm:$0xff] }
 0x2df   :  { %v1059_v54 = vand.u32 2147483647, %v419_v50 }
 0x2e0   :  { %v1676_v56 = vadd.f32 %v1675_v53, %v1036_v49  ;;  %v420_v53 = vld [vmem:[#allocation2 + $0xbf0] sm:$0xff] }
 0x2e1   :  { %v1060_v57 = vand.u32 2147483647, %v420_v53 }
 0x2e2   :  { %v1677_v59 = vadd.f32 %v1676_v56, %v1037_v52  ;;  %v421_v56 = vld [vmem:[#allocation2 + $0xbf8] sm:$0xff] }
 0x2e3   :  { %v1061_v60 = vand.u32 2147483647, %v421_v56 }
 0x2e4   :  { %v1678_v62 = vadd.f32 %v1677_v59, %v1038_v55  ;;  %v422_v59 = vld [vmem:[#allocation2 + $0xc00] sm:$0xff] }
 0x2e5   :  { %v1062_v63 = vand.u32 2147483647, %v422_v59 }
 0x2e6   :  { %v1679_v1 = vadd.f32 %v1678_v62, %v1039_v58  ;;  %v423_v62 = vld [vmem:[#allocation2 + $0xc08] sm:$0xff] }
 0x2e7   :  { %v1063_v2 = vand.u32 2147483647, %v423_v62 }
 0x2e8   :  { %v1680_v4 = vadd.f32 %v1679_v1, %v1040_v61  ;;  %v424_v1 = vld [vmem:[#allocation2 + $0xc10] sm:$0xff] }
 0x2e9   :  { %v1064_v5 = vand.u32 2147483647, %v424_v1 }
 0x2ea   :  { %v1681_v7 = vadd.f32 %v1680_v4, %v1041_v0  ;;  %v425_v4 = vld [vmem:[#allocation2 + $0xc18] sm:$0xff] }
 0x2eb   :  { %v1065_v8 = vand.u32 2147483647, %v425_v4 }
 0x2ec   :  { %v1682_v10 = vadd.f32 %v1681_v7, %v1042_v3  ;;  %v426_v7 = vld [vmem:[#allocation2 + $0xc20] sm:$0xff] }
 0x2ed   :  { %v1066_v11 = vand.u32 2147483647, %v426_v7 }
 0x2ee   :  { %v1683_v13 = vadd.f32 %v1682_v10, %v1043_v6  ;;  %v427_v10 = vld [vmem:[#allocation2 + $0xc28] sm:$0xff] }
 0x2ef   :  { %v1067_v14 = vand.u32 2147483647, %v427_v10 }
 0x2f0   :  { %v1684_v16 = vadd.f32 %v1683_v13, %v1044_v9  ;;  %v428_v13 = vld [vmem:[#allocation2 + $0xc30] sm:$0xff] }
 0x2f1   :  { %v1068_v17 = vand.u32 2147483647, %v428_v13 }
 0x2f2   :  { %v1685_v19 = vadd.f32 %v1684_v16, %v1045_v12  ;;  %v429_v16 = vld [vmem:[#allocation2 + $0xc38] sm:$0xff] }
 0x2f3   :  { %v1069_v20 = vand.u32 2147483647, %v429_v16 }
 0x2f4   :  { %v1686_v22 = vadd.f32 %v1685_v19, %v1046_v15  ;;  %v430_v19 = vld [vmem:[#allocation2 + $0xc40] sm:$0xff] }
 0x2f5   :  { %v1070_v23 = vand.u32 2147483647, %v430_v19 }
 0x2f6   :  { %v1687_v25 = vadd.f32 %v1686_v22, %v1047_v18  ;;  %v431_v22 = vld [vmem:[#allocation2 + $0xc48] sm:$0xff] }
 0x2f7   :  { %v1071_v26 = vand.u32 2147483647, %v431_v22 }
 0x2f8   :  { %v1688_v28 = vadd.f32 %v1687_v25, %v1048_v21  ;;  %v432_v25 = vld [vmem:[#allocation2 + $0xc50] sm:$0xff] }
 0x2f9   :  { %v1072_v29 = vand.u32 2147483647, %v432_v25 }
 0x2fa   :  { %v1689_v31 = vadd.f32 %v1688_v28, %v1049_v24  ;;  %v433_v28 = vld [vmem:[#allocation2 + $0xc58] sm:$0xff] }
 0x2fb   :  { %v1073_v32 = vand.u32 2147483647, %v433_v28 }
 0x2fc   :  { %v1690_v34 = vadd.f32 %v1689_v31, %v1050_v27  ;;  %v434_v31 = vld [vmem:[#allocation2 + $0xc60] sm:$0xff] }
 0x2fd   :  { %v1074_v35 = vand.u32 2147483647, %v434_v31 }
 0x2fe   :  { %v1691_v37 = vadd.f32 %v1690_v34, %v1051_v30  ;;  %v435_v34 = vld [vmem:[#allocation2 + $0xc68] sm:$0xff] }
 0x2ff   :  { %v1075_v38 = vand.u32 2147483647, %v435_v34 }
 0x300   :  { %v1692_v40 = vadd.f32 %v1691_v37, %v1052_v33  ;;  %v436_v37 = vld [vmem:[#allocation2 + $0xc70] sm:$0xff] }
 0x301   :  { %v1076_v41 = vand.u32 2147483647, %v436_v37 }
 0x302   :  { %v1693_v43 = vadd.f32 %v1692_v40, %v1053_v36  ;;  %v437_v40 = vld [vmem:[#allocation2 + $0xc78] sm:$0xff] }
 0x303   :  { %v1077_v44 = vand.u32 2147483647, %v437_v40 }
 0x304   :  { %v1694_v46 = vadd.f32 %v1693_v43, %v1054_v39  ;;  %v438_v43 = vld [vmem:[#allocation2 + $0xc80] sm:$0xff] }
 0x305   :  { %v1078_v47 = vand.u32 2147483647, %v438_v43 }
 0x306   :  { %v1695_v49 = vadd.f32 %v1694_v46, %v1055_v42  ;;  %v439_v46 = vld [vmem:[#allocation2 + $0xc88] sm:$0xff] }
 0x307   :  { %v1079_v50 = vand.u32 2147483647, %v439_v46 }
 0x308   :  { %v1696_v52 = vadd.f32 %v1695_v49, %v1056_v45  ;;  %v440_v49 = vld [vmem:[#allocation2 + $0xc90] sm:$0xff] }
 0x309   :  { %v1080_v53 = vand.u32 2147483647, %v440_v49 }
 0x30a   :  { %v1697_v55 = vadd.f32 %v1696_v52, %v1057_v48  ;;  %v441_v52 = vld [vmem:[#allocation2 + $0xc98] sm:$0xff] }
 0x30b   :  { %v1081_v56 = vand.u32 2147483647, %v441_v52 }
 0x30c   :  { %v1698_v58 = vadd.f32 %v1697_v55, %v1058_v51  ;;  %v442_v55 = vld [vmem:[#allocation2 + $0xca0] sm:$0xff] }
 0x30d   :  { %v1082_v59 = vand.u32 2147483647, %v442_v55 }
 0x30e   :  { %v1699_v61 = vadd.f32 %v1698_v58, %v1059_v54  ;;  %v443_v58 = vld [vmem:[#allocation2 + $0xca8] sm:$0xff] }
 0x30f   :  { %v1083_v62 = vand.u32 2147483647, %v443_v58 }
 0x310   :  { %v1700_v0 = vadd.f32 %v1699_v61, %v1060_v57  ;;  %v444_v61 = vld [vmem:[#allocation2 + $0xcb0] sm:$0xff] }
 0x311   :  { %v1084_v1 = vand.u32 2147483647, %v444_v61 }
 0x312   :  { %v1701_v3 = vadd.f32 %v1700_v0, %v1061_v60  ;;  %v445_v0 = vld [vmem:[#allocation2 + $0xcb8] sm:$0xff] }
 0x313   :  { %v1085_v4 = vand.u32 2147483647, %v445_v0 }
 0x314   :  { %v1702_v6 = vadd.f32 %v1701_v3, %v1062_v63  ;;  %v446_v3 = vld [vmem:[#allocation2 + $0xcc0] sm:$0xff] }
 0x315   :  { %v1086_v7 = vand.u32 2147483647, %v446_v3 }
 0x316   :  { %v1703_v9 = vadd.f32 %v1702_v6, %v1063_v2  ;;  %v447_v6 = vld [vmem:[#allocation2 + $0xcc8] sm:$0xff] }
 0x317   :  { %v1087_v10 = vand.u32 2147483647, %v447_v6 }
 0x318   :  { %v1704_v12 = vadd.f32 %v1703_v9, %v1064_v5  ;;  %v448_v9 = vld [vmem:[#allocation2 + $0xcd0] sm:$0xff] }
 0x319   :  { %v1088_v13 = vand.u32 2147483647, %v448_v9 }
 0x31a   :  { %v1705_v15 = vadd.f32 %v1704_v12, %v1065_v8  ;;  %v449_v12 = vld [vmem:[#allocation2 + $0xcd8] sm:$0xff] }
 0x31b   :  { %v1089_v16 = vand.u32 2147483647, %v449_v12 }
 0x31c   :  { %v1706_v18 = vadd.f32 %v1705_v15, %v1066_v11  ;;  %v450_v15 = vld [vmem:[#allocation2 + $0xce0] sm:$0xff] }
 0x31d   :  { %v1090_v19 = vand.u32 2147483647, %v450_v15 }
 0x31e   :  { %v1707_v21 = vadd.f32 %v1706_v18, %v1067_v14  ;;  %v451_v18 = vld [vmem:[#allocation2 + $0xce8] sm:$0xff] }
 0x31f   :  { %v1091_v22 = vand.u32 2147483647, %v451_v18 }
 0x320   :  { %v1708_v24 = vadd.f32 %v1707_v21, %v1068_v17  ;;  %v452_v21 = vld [vmem:[#allocation2 + $0xcf0] sm:$0xff] }
 0x321   :  { %v1092_v25 = vand.u32 2147483647, %v452_v21 }
 0x322   :  { %v1709_v27 = vadd.f32 %v1708_v24, %v1069_v20  ;;  %v453_v24 = vld [vmem:[#allocation2 + $0xcf8] sm:$0xff] }
 0x323   :  { %v1093_v28 = vand.u32 2147483647, %v453_v24 }
 0x324   :  { %v1710_v30 = vadd.f32 %v1709_v27, %v1070_v23  ;;  %v454_v27 = vld [vmem:[#allocation2 + $0xd00] sm:$0xff] }
 0x325   :  { %v1094_v31 = vand.u32 2147483647, %v454_v27 }
 0x326   :  { %v1711_v33 = vadd.f32 %v1710_v30, %v1071_v26  ;;  %v455_v30 = vld [vmem:[#allocation2 + $0xd08] sm:$0xff] }
 0x327   :  { %v1095_v34 = vand.u32 2147483647, %v455_v30 }
 0x328   :  { %v1712_v36 = vadd.f32 %v1711_v33, %v1072_v29  ;;  %v456_v33 = vld [vmem:[#allocation2 + $0xd10] sm:$0xff] }
 0x329   :  { %v1096_v37 = vand.u32 2147483647, %v456_v33 }
 0x32a   :  { %v1713_v39 = vadd.f32 %v1712_v36, %v1073_v32  ;;  %v457_v36 = vld [vmem:[#allocation2 + $0xd18] sm:$0xff] }
 0x32b   :  { %v1097_v40 = vand.u32 2147483647, %v457_v36 }
 0x32c   :  { %v1714_v42 = vadd.f32 %v1713_v39, %v1074_v35  ;;  %v458_v39 = vld [vmem:[#allocation2 + $0xd20] sm:$0xff] }
 0x32d   :  { %v1098_v43 = vand.u32 2147483647, %v458_v39 }
 0x32e   :  { %v1715_v45 = vadd.f32 %v1714_v42, %v1075_v38  ;;  %v459_v42 = vld [vmem:[#allocation2 + $0xd28] sm:$0xff] }
 0x32f   :  { %v1099_v46 = vand.u32 2147483647, %v459_v42 }
 0x330   :  { %v1716_v48 = vadd.f32 %v1715_v45, %v1076_v41  ;;  %v460_v45 = vld [vmem:[#allocation2 + $0xd30] sm:$0xff] }
 0x331   :  { %v1100_v49 = vand.u32 2147483647, %v460_v45 }
 0x332   :  { %v1717_v51 = vadd.f32 %v1716_v48, %v1077_v44  ;;  %v461_v48 = vld [vmem:[#allocation2 + $0xd38] sm:$0xff] }
 0x333   :  { %v1101_v52 = vand.u32 2147483647, %v461_v48 }
 0x334   :  { %v1718_v54 = vadd.f32 %v1717_v51, %v1078_v47  ;;  %v462_v51 = vld [vmem:[#allocation2 + $0xd40] sm:$0xff] }
 0x335   :  { %v1102_v55 = vand.u32 2147483647, %v462_v51 }
 0x336   :  { %v1719_v57 = vadd.f32 %v1718_v54, %v1079_v50  ;;  %v463_v54 = vld [vmem:[#allocation2 + $0xd48] sm:$0xff] }
 0x337   :  { %v1103_v58 = vand.u32 2147483647, %v463_v54 }
 0x338   :  { %v1720_v60 = vadd.f32 %v1719_v57, %v1080_v53  ;;  %v464_v57 = vld [vmem:[#allocation2 + $0xd50] sm:$0xff] }
 0x339   :  { %v1104_v61 = vand.u32 2147483647, %v464_v57 }
 0x33a   :  { %v1721_v63 = vadd.f32 %v1720_v60, %v1081_v56  ;;  %v465_v60 = vld [vmem:[#allocation2 + $0xd58] sm:$0xff] }
 0x33b   :  { %v1105_v0 = vand.u32 2147483647, %v465_v60 }
 0x33c   :  { %v1722_v2 = vadd.f32 %v1721_v63, %v1082_v59  ;;  %v466_v63 = vld [vmem:[#allocation2 + $0xd60] sm:$0xff] }
 0x33d   :  { %v1106_v3 = vand.u32 2147483647, %v466_v63 }
 0x33e   :  { %v1723_v5 = vadd.f32 %v1722_v2, %v1083_v62  ;;  %v467_v2 = vld [vmem:[#allocation2 + $0xd68] sm:$0xff] }
 0x33f   :  { %v1107_v6 = vand.u32 2147483647, %v467_v2 }
 0x340   :  { %v1724_v8 = vadd.f32 %v1723_v5, %v1084_v1  ;;  %v468_v5 = vld [vmem:[#allocation2 + $0xd70] sm:$0xff] }
 0x341   :  { %v1108_v9 = vand.u32 2147483647, %v468_v5 }
 0x342   :  { %v1725_v11 = vadd.f32 %v1724_v8, %v1085_v4  ;;  %v469_v8 = vld [vmem:[#allocation2 + $0xd78] sm:$0xff] }
 0x343   :  { %v1109_v12 = vand.u32 2147483647, %v469_v8 }
 0x344   :  { %v1726_v14 = vadd.f32 %v1725_v11, %v1086_v7  ;;  %v470_v11 = vld [vmem:[#allocation2 + $0xd80] sm:$0xff] }
 0x345   :  { %v1110_v15 = vand.u32 2147483647, %v470_v11 }
 0x346   :  { %v1727_v17 = vadd.f32 %v1726_v14, %v1087_v10  ;;  %v471_v14 = vld [vmem:[#allocation2 + $0xd88] sm:$0xff] }
 0x347   :  { %v1111_v18 = vand.u32 2147483647, %v471_v14 }
 0x348   :  { %v1728_v20 = vadd.f32 %v1727_v17, %v1088_v13  ;;  %v472_v17 = vld [vmem:[#allocation2 + $0xd90] sm:$0xff] }
 0x349   :  { %v1112_v21 = vand.u32 2147483647, %v472_v17 }
 0x34a   :  { %v1729_v23 = vadd.f32 %v1728_v20, %v1089_v16  ;;  %v473_v20 = vld [vmem:[#allocation2 + $0xd98] sm:$0xff] }
 0x34b   :  { %v1113_v24 = vand.u32 2147483647, %v473_v20 }
 0x34c   :  { %v1730_v26 = vadd.f32 %v1729_v23, %v1090_v19  ;;  %v474_v23 = vld [vmem:[#allocation2 + $0xda0] sm:$0xff] }
 0x34d   :  { %v1114_v27 = vand.u32 2147483647, %v474_v23 }
 0x34e   :  { %v1731_v29 = vadd.f32 %v1730_v26, %v1091_v22  ;;  %v475_v26 = vld [vmem:[#allocation2 + $0xda8] sm:$0xff] }
 0x34f   :  { %v1115_v30 = vand.u32 2147483647, %v475_v26 }
 0x350   :  { %v1732_v32 = vadd.f32 %v1731_v29, %v1092_v25  ;;  %v476_v29 = vld [vmem:[#allocation2 + $0xdb0] sm:$0xff] }
 0x351   :  { %v1116_v33 = vand.u32 2147483647, %v476_v29 }
 0x352   :  { %v1733_v35 = vadd.f32 %v1732_v32, %v1093_v28  ;;  %v477_v32 = vld [vmem:[#allocation2 + $0xdb8] sm:$0xff] }
 0x353   :  { %v1117_v36 = vand.u32 2147483647, %v477_v32 }
 0x354   :  { %v1734_v38 = vadd.f32 %v1733_v35, %v1094_v31  ;;  %v478_v35 = vld [vmem:[#allocation2 + $0xdc0] sm:$0xff] }
 0x355   :  { %v1118_v39 = vand.u32 2147483647, %v478_v35 }
 0x356   :  { %v1735_v41 = vadd.f32 %v1734_v38, %v1095_v34  ;;  %v479_v38 = vld [vmem:[#allocation2 + $0xdc8] sm:$0xff] }
 0x357   :  { %v1119_v42 = vand.u32 2147483647, %v479_v38 }
 0x358   :  { %v1736_v44 = vadd.f32 %v1735_v41, %v1096_v37  ;;  %v480_v41 = vld [vmem:[#allocation2 + $0xdd0] sm:$0xff] }
 0x359   :  { %v1120_v45 = vand.u32 2147483647, %v480_v41 }
 0x35a   :  { %v1737_v47 = vadd.f32 %v1736_v44, %v1097_v40  ;;  %v481_v44 = vld [vmem:[#allocation2 + $0xdd8] sm:$0xff] }
 0x35b   :  { %v1121_v48 = vand.u32 2147483647, %v481_v44 }
 0x35c   :  { %v1738_v50 = vadd.f32 %v1737_v47, %v1098_v43  ;;  %v482_v47 = vld [vmem:[#allocation2 + $0xde0] sm:$0xff] }
 0x35d   :  { %v1122_v51 = vand.u32 2147483647, %v482_v47 }
 0x35e   :  { %v1739_v53 = vadd.f32 %v1738_v50, %v1099_v46  ;;  %v483_v50 = vld [vmem:[#allocation2 + $0xde8] sm:$0xff] }
 0x35f   :  { %v1123_v54 = vand.u32 2147483647, %v483_v50 }
 0x360   :  { %v1740_v56 = vadd.f32 %v1739_v53, %v1100_v49  ;;  %v484_v53 = vld [vmem:[#allocation2 + $0xdf0] sm:$0xff] }
 0x361   :  { %v1124_v57 = vand.u32 2147483647, %v484_v53 }
 0x362   :  { %v1741_v59 = vadd.f32 %v1740_v56, %v1101_v52  ;;  %v485_v56 = vld [vmem:[#allocation2 + $0xdf8] sm:$0xff] }
 0x363   :  { %v1125_v60 = vand.u32 2147483647, %v485_v56 }
 0x364   :  { %v1742_v62 = vadd.f32 %v1741_v59, %v1102_v55  ;;  %v486_v59 = vld [vmem:[#allocation2 + $0xe00] sm:$0xff] }
 0x365   :  { %v1126_v63 = vand.u32 2147483647, %v486_v59 }
 0x366   :  { %v1743_v1 = vadd.f32 %v1742_v62, %v1103_v58  ;;  %v487_v62 = vld [vmem:[#allocation2 + $0xe08] sm:$0xff] }
 0x367   :  { %v1127_v2 = vand.u32 2147483647, %v487_v62 }
 0x368   :  { %v1744_v4 = vadd.f32 %v1743_v1, %v1104_v61  ;;  %v488_v1 = vld [vmem:[#allocation2 + $0xe10] sm:$0xff] }
 0x369   :  { %v1128_v5 = vand.u32 2147483647, %v488_v1 }
 0x36a   :  { %v1745_v7 = vadd.f32 %v1744_v4, %v1105_v0  ;;  %v489_v4 = vld [vmem:[#allocation2 + $0xe18] sm:$0xff] }
 0x36b   :  { %v1129_v8 = vand.u32 2147483647, %v489_v4 }
 0x36c   :  { %v1746_v10 = vadd.f32 %v1745_v7, %v1106_v3  ;;  %v490_v7 = vld [vmem:[#allocation2 + $0xe20] sm:$0xff] }
 0x36d   :  { %v1130_v11 = vand.u32 2147483647, %v490_v7 }
 0x36e   :  { %v1747_v13 = vadd.f32 %v1746_v10, %v1107_v6  ;;  %v491_v10 = vld [vmem:[#allocation2 + $0xe28] sm:$0xff] }
 0x36f   :  { %v1131_v14 = vand.u32 2147483647, %v491_v10 }
 0x370   :  { %v1748_v16 = vadd.f32 %v1747_v13, %v1108_v9  ;;  %v492_v13 = vld [vmem:[#allocation2 + $0xe30] sm:$0xff] }
 0x371   :  { %v1132_v17 = vand.u32 2147483647, %v492_v13 }
 0x372   :  { %v1749_v19 = vadd.f32 %v1748_v16, %v1109_v12  ;;  %v493_v16 = vld [vmem:[#allocation2 + $0xe38] sm:$0xff] }
 0x373   :  { %v1133_v20 = vand.u32 2147483647, %v493_v16 }
 0x374   :  { %v1750_v22 = vadd.f32 %v1749_v19, %v1110_v15  ;;  %v494_v19 = vld [vmem:[#allocation2 + $0xe40] sm:$0xff] }
 0x375   :  { %v1134_v23 = vand.u32 2147483647, %v494_v19 }
 0x376   :  { %v1751_v25 = vadd.f32 %v1750_v22, %v1111_v18  ;;  %v495_v22 = vld [vmem:[#allocation2 + $0xe48] sm:$0xff] }
 0x377   :  { %v1135_v26 = vand.u32 2147483647, %v495_v22 }
 0x378   :  { %v1752_v28 = vadd.f32 %v1751_v25, %v1112_v21  ;;  %v496_v25 = vld [vmem:[#allocation2 + $0xe50] sm:$0xff] }
 0x379   :  { %v1136_v29 = vand.u32 2147483647, %v496_v25 }
 0x37a   :  { %v1753_v31 = vadd.f32 %v1752_v28, %v1113_v24  ;;  %v497_v28 = vld [vmem:[#allocation2 + $0xe58] sm:$0xff] }
 0x37b   :  { %v1137_v32 = vand.u32 2147483647, %v497_v28 }
 0x37c   :  { %v1754_v34 = vadd.f32 %v1753_v31, %v1114_v27  ;;  %v498_v31 = vld [vmem:[#allocation2 + $0xe60] sm:$0xff] }
 0x37d   :  { %v1138_v35 = vand.u32 2147483647, %v498_v31 }
 0x37e   :  { %v1755_v37 = vadd.f32 %v1754_v34, %v1115_v30  ;;  %v499_v34 = vld [vmem:[#allocation2 + $0xe68] sm:$0xff] }
 0x37f   :  { %v1139_v38 = vand.u32 2147483647, %v499_v34 }
 0x380   :  { %v1756_v40 = vadd.f32 %v1755_v37, %v1116_v33  ;;  %v500_v37 = vld [vmem:[#allocation2 + $0xe70] sm:$0xff] }
 0x381   :  { %v1140_v41 = vand.u32 2147483647, %v500_v37 }
 0x382   :  { %v1757_v43 = vadd.f32 %v1756_v40, %v1117_v36  ;;  %v501_v40 = vld [vmem:[#allocation2 + $0xe78] sm:$0xff] }
 0x383   :  { %v1141_v44 = vand.u32 2147483647, %v501_v40 }
 0x384   :  { %v1758_v46 = vadd.f32 %v1757_v43, %v1118_v39  ;;  %v502_v43 = vld [vmem:[#allocation2 + $0xe80] sm:$0xff] }
 0x385   :  { %v1142_v47 = vand.u32 2147483647, %v502_v43 }
 0x386   :  { %v1759_v49 = vadd.f32 %v1758_v46, %v1119_v42  ;;  %v503_v46 = vld [vmem:[#allocation2 + $0xe88] sm:$0xff] }
 0x387   :  { %v1143_v50 = vand.u32 2147483647, %v503_v46 }
 0x388   :  { %v1760_v52 = vadd.f32 %v1759_v49, %v1120_v45  ;;  %v504_v49 = vld [vmem:[#allocation2 + $0xe90] sm:$0xff] }
 0x389   :  { %v1144_v53 = vand.u32 2147483647, %v504_v49 }
 0x38a   :  { %v1761_v55 = vadd.f32 %v1760_v52, %v1121_v48  ;;  %v505_v52 = vld [vmem:[#allocation2 + $0xe98] sm:$0xff] }
 0x38b   :  { %v1145_v56 = vand.u32 2147483647, %v505_v52 }
 0x38c   :  { %v1762_v58 = vadd.f32 %v1761_v55, %v1122_v51  ;;  %v506_v55 = vld [vmem:[#allocation2 + $0xea0] sm:$0xff] }
 0x38d   :  { %v1146_v59 = vand.u32 2147483647, %v506_v55 }
 0x38e   :  { %v1763_v61 = vadd.f32 %v1762_v58, %v1123_v54  ;;  %v507_v58 = vld [vmem:[#allocation2 + $0xea8] sm:$0xff] }
 0x38f   :  { %v1147_v62 = vand.u32 2147483647, %v507_v58 }
 0x390   :  { %v1764_v0 = vadd.f32 %v1763_v61, %v1124_v57  ;;  %v508_v61 = vld [vmem:[#allocation2 + $0xeb0] sm:$0xff] }
 0x391   :  { %v1148_v1 = vand.u32 2147483647, %v508_v61 }
 0x392   :  { %v1765_v3 = vadd.f32 %v1764_v0, %v1125_v60  ;;  %v509_v0 = vld [vmem:[#allocation2 + $0xeb8] sm:$0xff] }
 0x393   :  { %v1149_v4 = vand.u32 2147483647, %v509_v0 }
 0x394   :  { %v1766_v6 = vadd.f32 %v1765_v3, %v1126_v63  ;;  %v510_v3 = vld [vmem:[#allocation2 + $0xec0] sm:$0xff] }
 0x395   :  { %v1150_v7 = vand.u32 2147483647, %v510_v3 }
 0x396   :  { %v1767_v9 = vadd.f32 %v1766_v6, %v1127_v2  ;;  %v511_v6 = vld [vmem:[#allocation2 + $0xec8] sm:$0xff] }
 0x397   :  { %v1151_v10 = vand.u32 2147483647, %v511_v6 }
 0x398   :  { %v1768_v12 = vadd.f32 %v1767_v9, %v1128_v5  ;;  %v512_v9 = vld [vmem:[#allocation2 + $0xed0] sm:$0xff] }
 0x399   :  { %v1152_v13 = vand.u32 2147483647, %v512_v9 }
 0x39a   :  { %v1769_v15 = vadd.f32 %v1768_v12, %v1129_v8  ;;  %v513_v12 = vld [vmem:[#allocation2 + $0xed8] sm:$0xff] }
 0x39b   :  { %v1153_v16 = vand.u32 2147483647, %v513_v12 }
 0x39c   :  { %v1770_v18 = vadd.f32 %v1769_v15, %v1130_v11  ;;  %v514_v15 = vld [vmem:[#allocation2 + $0xee0] sm:$0xff] }
 0x39d   :  { %v1154_v19 = vand.u32 2147483647, %v514_v15 }
 0x39e   :  { %v1771_v21 = vadd.f32 %v1770_v18, %v1131_v14  ;;  %v515_v18 = vld [vmem:[#allocation2 + $0xee8] sm:$0xff] }
 0x39f   :  { %v1155_v22 = vand.u32 2147483647, %v515_v18 }
 0x3a0   :  { %v1772_v24 = vadd.f32 %v1771_v21, %v1132_v17  ;;  %v516_v21 = vld [vmem:[#allocation2 + $0xef0] sm:$0xff] }
 0x3a1   :  { %v1156_v25 = vand.u32 2147483647, %v516_v21 }
 0x3a2   :  { %v1773_v27 = vadd.f32 %v1772_v24, %v1133_v20  ;;  %v517_v24 = vld [vmem:[#allocation2 + $0xef8] sm:$0xff] }
 0x3a3   :  { %v1157_v28 = vand.u32 2147483647, %v517_v24 }
 0x3a4   :  { %v1774_v30 = vadd.f32 %v1773_v27, %v1134_v23  ;;  %v518_v27 = vld [vmem:[#allocation2 + $0xf00] sm:$0xff] }
 0x3a5   :  { %v1158_v31 = vand.u32 2147483647, %v518_v27 }
 0x3a6   :  { %v1775_v33 = vadd.f32 %v1774_v30, %v1135_v26  ;;  %v519_v30 = vld [vmem:[#allocation2 + $0xf08] sm:$0xff] }
 0x3a7   :  { %v1159_v34 = vand.u32 2147483647, %v519_v30 }
 0x3a8   :  { %v1776_v36 = vadd.f32 %v1775_v33, %v1136_v29  ;;  %v520_v33 = vld [vmem:[#allocation2 + $0xf10] sm:$0xff] }
 0x3a9   :  { %v1160_v37 = vand.u32 2147483647, %v520_v33 }
 0x3aa   :  { %v1777_v39 = vadd.f32 %v1776_v36, %v1137_v32  ;;  %v521_v36 = vld [vmem:[#allocation2 + $0xf18] sm:$0xff] }
 0x3ab   :  { %v1161_v40 = vand.u32 2147483647, %v521_v36 }
 0x3ac   :  { %v1778_v42 = vadd.f32 %v1777_v39, %v1138_v35  ;;  %v522_v39 = vld [vmem:[#allocation2 + $0xf20] sm:$0xff] }
 0x3ad   :  { %v1162_v43 = vand.u32 2147483647, %v522_v39 }
 0x3ae   :  { %v1779_v45 = vadd.f32 %v1778_v42, %v1139_v38  ;;  %v523_v42 = vld [vmem:[#allocation2 + $0xf28] sm:$0xff] }
 0x3af   :  { %v1163_v46 = vand.u32 2147483647, %v523_v42 }
 0x3b0   :  { %v1780_v48 = vadd.f32 %v1779_v45, %v1140_v41  ;;  %v524_v45 = vld [vmem:[#allocation2 + $0xf30] sm:$0xff] }
 0x3b1   :  { %v1164_v49 = vand.u32 2147483647, %v524_v45 }
 0x3b2   :  { %v1781_v51 = vadd.f32 %v1780_v48, %v1141_v44  ;;  %v525_v48 = vld [vmem:[#allocation2 + $0xf38] sm:$0xff] }
 0x3b3   :  { %v1165_v52 = vand.u32 2147483647, %v525_v48 }
 0x3b4   :  { %v1782_v54 = vadd.f32 %v1781_v51, %v1142_v47  ;;  %v526_v51 = vld [vmem:[#allocation2 + $0xf40] sm:$0xff] }
 0x3b5   :  { %v1166_v55 = vand.u32 2147483647, %v526_v51 }
 0x3b6   :  { %v1783_v57 = vadd.f32 %v1782_v54, %v1143_v50  ;;  %v527_v54 = vld [vmem:[#allocation2 + $0xf48] sm:$0xff] }
 0x3b7   :  { %v1167_v58 = vand.u32 2147483647, %v527_v54 }
 0x3b8   :  { %v1784_v60 = vadd.f32 %v1783_v57, %v1144_v53  ;;  %v528_v57 = vld [vmem:[#allocation2 + $0xf50] sm:$0xff] }
 0x3b9   :  { %v1168_v61 = vand.u32 2147483647, %v528_v57 }
 0x3ba   :  { %v1785_v63 = vadd.f32 %v1784_v60, %v1145_v56  ;;  %v529_v60 = vld [vmem:[#allocation2 + $0xf58] sm:$0xff] }
 0x3bb   :  { %v1169_v0 = vand.u32 2147483647, %v529_v60 }
 0x3bc   :  { %v1786_v2 = vadd.f32 %v1785_v63, %v1146_v59  ;;  %v530_v63 = vld [vmem:[#allocation2 + $0xf60] sm:$0xff] }
 0x3bd   :  { %v1170_v3 = vand.u32 2147483647, %v530_v63 }
 0x3be   :  { %v1787_v5 = vadd.f32 %v1786_v2, %v1147_v62  ;;  %v531_v2 = vld [vmem:[#allocation2 + $0xf68] sm:$0xff] }
 0x3bf   :  { %v1171_v6 = vand.u32 2147483647, %v531_v2 }
 0x3c0   :  { %v1788_v8 = vadd.f32 %v1787_v5, %v1148_v1  ;;  %v532_v5 = vld [vmem:[#allocation2 + $0xf70] sm:$0xff] }
 0x3c1   :  { %v1172_v9 = vand.u32 2147483647, %v532_v5 }
 0x3c2   :  { %v1789_v11 = vadd.f32 %v1788_v8, %v1149_v4  ;;  %v533_v8 = vld [vmem:[#allocation2 + $0xf78] sm:$0xff] }
 0x3c3   :  { %v1173_v12 = vand.u32 2147483647, %v533_v8 }
 0x3c4   :  { %v1790_v14 = vadd.f32 %v1789_v11, %v1150_v7  ;;  %v534_v11 = vld [vmem:[#allocation2 + $0xf80] sm:$0xff] }
 0x3c5   :  { %v1174_v15 = vand.u32 2147483647, %v534_v11 }
 0x3c6   :  { %v1791_v17 = vadd.f32 %v1790_v14, %v1151_v10  ;;  %v535_v14 = vld [vmem:[#allocation2 + $0xf88] sm:$0xff] }
 0x3c7   :  { %v1175_v18 = vand.u32 2147483647, %v535_v14 }
 0x3c8   :  { %v1792_v20 = vadd.f32 %v1791_v17, %v1152_v13  ;;  %v536_v17 = vld [vmem:[#allocation2 + $0xf90] sm:$0xff] }
 0x3c9   :  { %v1176_v21 = vand.u32 2147483647, %v536_v17 }
 0x3ca   :  { %v1793_v23 = vadd.f32 %v1792_v20, %v1153_v16  ;;  %v537_v20 = vld [vmem:[#allocation2 + $0xf98] sm:$0xff] }
 0x3cb   :  { %v1177_v24 = vand.u32 2147483647, %v537_v20 }
 0x3cc   :  { %v1794_v26 = vadd.f32 %v1793_v23, %v1154_v19  ;;  %v538_v23 = vld [vmem:[#allocation2 + $0xfa0] sm:$0xff] }
 0x3cd   :  { %v1178_v27 = vand.u32 2147483647, %v538_v23 }
 0x3ce   :  { %v1795_v29 = vadd.f32 %v1794_v26, %v1155_v22  ;;  %v539_v26 = vld [vmem:[#allocation2 + $0xfa8] sm:$0xff] }
 0x3cf   :  { %v1179_v30 = vand.u32 2147483647, %v539_v26 }
 0x3d0   :  { %v1796_v32 = vadd.f32 %v1795_v29, %v1156_v25  ;;  %v540_v29 = vld [vmem:[#allocation2 + $0xfb0] sm:$0xff] }
 0x3d1   :  { %v1180_v33 = vand.u32 2147483647, %v540_v29 }
 0x3d2   :  { %v1797_v35 = vadd.f32 %v1796_v32, %v1157_v28  ;;  %v541_v32 = vld [vmem:[#allocation2 + $0xfb8] sm:$0xff] }
 0x3d3   :  { %v1181_v36 = vand.u32 2147483647, %v541_v32 }
 0x3d4   :  { %v1798_v38 = vadd.f32 %v1797_v35, %v1158_v31  ;;  %v542_v35 = vld [vmem:[#allocation2 + $0xfc0] sm:$0xff] }
 0x3d5   :  { %v1182_v39 = vand.u32 2147483647, %v542_v35 }
 0x3d6   :  { %v1799_v41 = vadd.f32 %v1798_v38, %v1159_v34  ;;  %v543_v38 = vld [vmem:[#allocation2 + $0xfc8] sm:$0xff] }
 0x3d7   :  { %v1183_v42 = vand.u32 2147483647, %v543_v38 }
 0x3d8   :  { %v1800_v44 = vadd.f32 %v1799_v41, %v1160_v37  ;;  %v544_v41 = vld [vmem:[#allocation2 + $0xfd0] sm:$0xff] }
 0x3d9   :  { %v1184_v45 = vand.u32 2147483647, %v544_v41 }
 0x3da   :  { %v1801_v47 = vadd.f32 %v1800_v44, %v1161_v40  ;;  %v545_v44 = vld [vmem:[#allocation2 + $0xfd8] sm:$0xff] }
 0x3db   :  { %v1185_v48 = vand.u32 2147483647, %v545_v44 }
 0x3dc   :  { %v1802_v50 = vadd.f32 %v1801_v47, %v1162_v43  ;;  %v546_v47 = vld [vmem:[#allocation2 + $0xfe0] sm:$0xff] }
 0x3dd   :  { %v1186_v51 = vand.u32 2147483647, %v546_v47 }
 0x3de   :  { %v1803_v53 = vadd.f32 %v1802_v50, %v1163_v46  ;;  %v547_v50 = vld [vmem:[#allocation2 + $0xfe8] sm:$0xff] }
 0x3df   :  { %v1187_v54 = vand.u32 2147483647, %v547_v50 }
 0x3e0   :  { %v1804_v56 = vadd.f32 %v1803_v53, %v1164_v49  ;;  %v548_v53 = vld [vmem:[#allocation2 + $0xff0] sm:$0xff] }
 0x3e1   :  { %v1188_v57 = vand.u32 2147483647, %v548_v53 }
 0x3e2   :  { %v1805_v59 = vadd.f32 %v1804_v56, %v1165_v52  ;;  %v549_v56 = vld [vmem:[#allocation2 + $0xff8] sm:$0xff] }
 0x3e3   :  { %v1189_v60 = vand.u32 2147483647, %v549_v56 }
 0x3e4   :  { %v1806_v62 = vadd.f32 %v1805_v59, %v1166_v55  ;;  %v550_v59 = vld [vmem:[#allocation2 + $0x1000] sm:$0xff] }
 0x3e5   :  { %v1190_v63 = vand.u32 2147483647, %v550_v59 }
 0x3e6   :  { %v1807_v1 = vadd.f32 %v1806_v62, %v1167_v58  ;;  %v551_v62 = vld [vmem:[#allocation2 + $0x1008] sm:$0xff] }
 0x3e7   :  { %v1191_v2 = vand.u32 2147483647, %v551_v62 }
 0x3e8   :  { %v1808_v4 = vadd.f32 %v1807_v1, %v1168_v61  ;;  %v552_v1 = vld [vmem:[#allocation2 + $0x1010] sm:$0xff] }
 0x3e9   :  { %v1192_v5 = vand.u32 2147483647, %v552_v1 }
 0x3ea   :  { %v1809_v7 = vadd.f32 %v1808_v4, %v1169_v0  ;;  %v553_v4 = vld [vmem:[#allocation2 + $0x1018] sm:$0xff] }
 0x3eb   :  { %v1193_v8 = vand.u32 2147483647, %v553_v4 }
 0x3ec   :  { %v1810_v10 = vadd.f32 %v1809_v7, %v1170_v3  ;;  %v554_v7 = vld [vmem:[#allocation2 + $0x1020] sm:$0xff] }
 0x3ed   :  { %v1194_v11 = vand.u32 2147483647, %v554_v7 }
 0x3ee   :  { %v1811_v13 = vadd.f32 %v1810_v10, %v1171_v6  ;;  %v555_v10 = vld [vmem:[#allocation2 + $0x1028] sm:$0xff] }
 0x3ef   :  { %v1195_v14 = vand.u32 2147483647, %v555_v10 }
 0x3f0   :  { %v1812_v16 = vadd.f32 %v1811_v13, %v1172_v9  ;;  %v556_v13 = vld [vmem:[#allocation2 + $0x1030] sm:$0xff] }
 0x3f1   :  { %v1196_v17 = vand.u32 2147483647, %v556_v13 }
 0x3f2   :  { %v1813_v19 = vadd.f32 %v1812_v16, %v1173_v12  ;;  %v557_v16 = vld [vmem:[#allocation2 + $0x1038] sm:$0xff] }
 0x3f3   :  { %v1197_v20 = vand.u32 2147483647, %v557_v16 }
 0x3f4   :  { %v1814_v22 = vadd.f32 %v1813_v19, %v1174_v15  ;;  %v558_v19 = vld [vmem:[#allocation2 + $0x1040] sm:$0xff] }
 0x3f5   :  { %v1198_v23 = vand.u32 2147483647, %v558_v19 }
 0x3f6   :  { %v1815_v25 = vadd.f32 %v1814_v22, %v1175_v18  ;;  %v559_v22 = vld [vmem:[#allocation2 + $0x1048] sm:$0xff] }
 0x3f7   :  { %v1199_v26 = vand.u32 2147483647, %v559_v22 }
 0x3f8   :  { %v1816_v28 = vadd.f32 %v1815_v25, %v1176_v21  ;;  %v560_v25 = vld [vmem:[#allocation2 + $0x1050] sm:$0xff] }
 0x3f9   :  { %v1200_v29 = vand.u32 2147483647, %v560_v25 }
 0x3fa   :  { %v1817_v31 = vadd.f32 %v1816_v28, %v1177_v24  ;;  %v561_v28 = vld [vmem:[#allocation2 + $0x1058] sm:$0xff] }
 0x3fb   :  { %v1201_v32 = vand.u32 2147483647, %v561_v28 }
 0x3fc   :  { %v1818_v34 = vadd.f32 %v1817_v31, %v1178_v27  ;;  %v562_v31 = vld [vmem:[#allocation2 + $0x1060] sm:$0xff] }
 0x3fd   :  { %v1202_v35 = vand.u32 2147483647, %v562_v31 }
 0x3fe   :  { %v1819_v37 = vadd.f32 %v1818_v34, %v1179_v30  ;;  %v563_v34 = vld [vmem:[#allocation2 + $0x1068] sm:$0xff] }
 0x3ff   :  { %v1203_v38 = vand.u32 2147483647, %v563_v34 }
 0x400   :  { %v1820_v40 = vadd.f32 %v1819_v37, %v1180_v33  ;;  %v564_v37 = vld [vmem:[#allocation2 + $0x1070] sm:$0xff] }
 0x401   :  { %v1204_v41 = vand.u32 2147483647, %v564_v37 }
 0x402   :  { %v1821_v43 = vadd.f32 %v1820_v40, %v1181_v36  ;;  %v565_v40 = vld [vmem:[#allocation2 + $0x1078] sm:$0xff] }
 0x403   :  { %v1205_v44 = vand.u32 2147483647, %v565_v40 }
 0x404   :  { %v1822_v46 = vadd.f32 %v1821_v43, %v1182_v39  ;;  %v566_v43 = vld [vmem:[#allocation2 + $0x1080] sm:$0xff] }
 0x405   :  { %v1206_v47 = vand.u32 2147483647, %v566_v43 }
 0x406   :  { %v1823_v49 = vadd.f32 %v1822_v46, %v1183_v42  ;;  %v567_v46 = vld [vmem:[#allocation2 + $0x1088] sm:$0xff] }
 0x407   :  { %v1207_v50 = vand.u32 2147483647, %v567_v46 }
 0x408   :  { %v1824_v52 = vadd.f32 %v1823_v49, %v1184_v45  ;;  %v568_v49 = vld [vmem:[#allocation2 + $0x1090] sm:$0xff] }
 0x409   :  { %v1208_v53 = vand.u32 2147483647, %v568_v49 }
 0x40a   :  { %v1825_v55 = vadd.f32 %v1824_v52, %v1185_v48  ;;  %v569_v52 = vld [vmem:[#allocation2 + $0x1098] sm:$0xff] }
 0x40b   :  { %v1209_v56 = vand.u32 2147483647, %v569_v52 }
 0x40c   :  { %v1826_v58 = vadd.f32 %v1825_v55, %v1186_v51  ;;  %v570_v55 = vld [vmem:[#allocation2 + $0x10a0] sm:$0xff] }
 0x40d   :  { %v1210_v59 = vand.u32 2147483647, %v570_v55 }
 0x40e   :  { %v1827_v61 = vadd.f32 %v1826_v58, %v1187_v54  ;;  %v571_v58 = vld [vmem:[#allocation2 + $0x10a8] sm:$0xff] }
 0x40f   :  { %v1211_v62 = vand.u32 2147483647, %v571_v58 }
 0x410   :  { %v1828_v0 = vadd.f32 %v1827_v61, %v1188_v57  ;;  %v572_v61 = vld [vmem:[#allocation2 + $0x10b0] sm:$0xff] }
 0x411   :  { %v1212_v1 = vand.u32 2147483647, %v572_v61 }
 0x412   :  { %v1829_v3 = vadd.f32 %v1828_v0, %v1189_v60  ;;  %v573_v0 = vld [vmem:[#allocation2 + $0x10b8] sm:$0xff] }
 0x413   :  { %v1213_v4 = vand.u32 2147483647, %v573_v0 }
 0x414   :  { %v1830_v6 = vadd.f32 %v1829_v3, %v1190_v63  ;;  %v574_v3 = vld [vmem:[#allocation2 + $0x10c0] sm:$0xff] }
 0x415   :  { %v1214_v7 = vand.u32 2147483647, %v574_v3 }
 0x416   :  { %v1831_v9 = vadd.f32 %v1830_v6, %v1191_v2  ;;  %v575_v6 = vld [vmem:[#allocation2 + $0x10c8] sm:$0xff] }
 0x417   :  { %v1215_v10 = vand.u32 2147483647, %v575_v6 }
 0x418   :  { %v1832_v12 = vadd.f32 %v1831_v9, %v1192_v5  ;;  %v576_v9 = vld [vmem:[#allocation2 + $0x10d0] sm:$0xff] }
 0x419   :  { %v1216_v13 = vand.u32 2147483647, %v576_v9 }
 0x41a   :  { %v1833_v15 = vadd.f32 %v1832_v12, %v1193_v8  ;;  %v577_v12 = vld [vmem:[#allocation2 + $0x10d8] sm:$0xff] }
 0x41b   :  { %v1217_v16 = vand.u32 2147483647, %v577_v12 }
 0x41c   :  { %v1834_v18 = vadd.f32 %v1833_v15, %v1194_v11  ;;  %v578_v15 = vld [vmem:[#allocation2 + $0x10e0] sm:$0xff] }
 0x41d   :  { %v1218_v19 = vand.u32 2147483647, %v578_v15 }
 0x41e   :  { %v1835_v21 = vadd.f32 %v1834_v18, %v1195_v14  ;;  %v579_v18 = vld [vmem:[#allocation2 + $0x10e8] sm:$0xff] }
 0x41f   :  { %v1219_v22 = vand.u32 2147483647, %v579_v18 }
 0x420   :  { %v1836_v24 = vadd.f32 %v1835_v21, %v1196_v17  ;;  %v580_v21 = vld [vmem:[#allocation2 + $0x10f0] sm:$0xff] }
 0x421   :  { %v1220_v25 = vand.u32 2147483647, %v580_v21 }
 0x422   :  { %v1837_v27 = vadd.f32 %v1836_v24, %v1197_v20  ;;  %v581_v24 = vld [vmem:[#allocation2 + $0x10f8] sm:$0xff] }
 0x423   :  { %v1221_v28 = vand.u32 2147483647, %v581_v24 }
 0x424   :  { %v1838_v30 = vadd.f32 %v1837_v27, %v1198_v23  ;;  %v582_v27 = vld [vmem:[#allocation2 + $0x1100] sm:$0xff] }
 0x425   :  { %v1222_v31 = vand.u32 2147483647, %v582_v27 }
 0x426   :  { %v1839_v33 = vadd.f32 %v1838_v30, %v1199_v26  ;;  %v583_v30 = vld [vmem:[#allocation2 + $0x1108] sm:$0xff] }
 0x427   :  { %v1223_v34 = vand.u32 2147483647, %v583_v30 }
 0x428   :  { %v1840_v36 = vadd.f32 %v1839_v33, %v1200_v29  ;;  %v584_v33 = vld [vmem:[#allocation2 + $0x1110] sm:$0xff] }
 0x429   :  { %v1224_v37 = vand.u32 2147483647, %v584_v33 }
 0x42a   :  { %v1841_v39 = vadd.f32 %v1840_v36, %v1201_v32  ;;  %v585_v36 = vld [vmem:[#allocation2 + $0x1118] sm:$0xff] }
 0x42b   :  { %v1225_v40 = vand.u32 2147483647, %v585_v36 }
 0x42c   :  { %v1842_v42 = vadd.f32 %v1841_v39, %v1202_v35  ;;  %v586_v39 = vld [vmem:[#allocation2 + $0x1120] sm:$0xff] }
 0x42d   :  { %v1226_v43 = vand.u32 2147483647, %v586_v39 }
 0x42e   :  { %v1843_v45 = vadd.f32 %v1842_v42, %v1203_v38  ;;  %v587_v42 = vld [vmem:[#allocation2 + $0x1128] sm:$0xff] }
 0x42f   :  { %v1227_v46 = vand.u32 2147483647, %v587_v42 }
 0x430   :  { %v1844_v48 = vadd.f32 %v1843_v45, %v1204_v41  ;;  %v588_v45 = vld [vmem:[#allocation2 + $0x1130] sm:$0xff] }
 0x431   :  { %v1228_v49 = vand.u32 2147483647, %v588_v45 }
 0x432   :  { %v1845_v51 = vadd.f32 %v1844_v48, %v1205_v44  ;;  %v589_v48 = vld [vmem:[#allocation2 + $0x1138] sm:$0xff] }
 0x433   :  { %v1229_v52 = vand.u32 2147483647, %v589_v48 }
 0x434   :  { %v1846_v54 = vadd.f32 %v1845_v51, %v1206_v47  ;;  %v590_v51 = vld [vmem:[#allocation2 + $0x1140] sm:$0xff] }
 0x435   :  { %v1230_v55 = vand.u32 2147483647, %v590_v51 }
 0x436   :  { %v1847_v57 = vadd.f32 %v1846_v54, %v1207_v50  ;;  %v591_v54 = vld [vmem:[#allocation2 + $0x1148] sm:$0xff] }
 0x437   :  { %v1231_v58 = vand.u32 2147483647, %v591_v54 }
 0x438   :  { %v1848_v60 = vadd.f32 %v1847_v57, %v1208_v53  ;;  %v592_v57 = vld [vmem:[#allocation2 + $0x1150] sm:$0xff] }
 0x439   :  { %v1232_v61 = vand.u32 2147483647, %v592_v57 }
 0x43a   :  { %v1849_v63 = vadd.f32 %v1848_v60, %v1209_v56  ;;  %v593_v60 = vld [vmem:[#allocation2 + $0x1158] sm:$0xff] }
 0x43b   :  { %v1233_v0 = vand.u32 2147483647, %v593_v60 }
 0x43c   :  { %v1850_v2 = vadd.f32 %v1849_v63, %v1210_v59  ;;  %v594_v63 = vld [vmem:[#allocation2 + $0x1160] sm:$0xff] }
 0x43d   :  { %v1234_v3 = vand.u32 2147483647, %v594_v63 }
 0x43e   :  { %v1851_v5 = vadd.f32 %v1850_v2, %v1211_v62  ;;  %v595_v2 = vld [vmem:[#allocation2 + $0x1168] sm:$0xff] }
 0x43f   :  { %v1235_v6 = vand.u32 2147483647, %v595_v2 }
 0x440   :  { %v1852_v8 = vadd.f32 %v1851_v5, %v1212_v1  ;;  %v596_v5 = vld [vmem:[#allocation2 + $0x1170] sm:$0xff] }
 0x441   :  { %v1236_v9 = vand.u32 2147483647, %v596_v5 }
 0x442   :  { %v1853_v11 = vadd.f32 %v1852_v8, %v1213_v4  ;;  %v597_v8 = vld [vmem:[#allocation2 + $0x1178] sm:$0xff] }
 0x443   :  { %v1237_v12 = vand.u32 2147483647, %v597_v8 }
 0x444   :  { %v1854_v14 = vadd.f32 %v1853_v11, %v1214_v7  ;;  %v598_v11 = vld [vmem:[#allocation2 + $0x1180] sm:$0xff] }
 0x445   :  { %v1238_v15 = vand.u32 2147483647, %v598_v11 }
 0x446   :  { %v1855_v17 = vadd.f32 %v1854_v14, %v1215_v10  ;;  %v599_v14 = vld [vmem:[#allocation2 + $0x1188] sm:$0xff] }
 0x447   :  { %v1239_v18 = vand.u32 2147483647, %v599_v14 }
 0x448   :  { %v1856_v20 = vadd.f32 %v1855_v17, %v1216_v13  ;;  %v600_v17 = vld [vmem:[#allocation2 + $0x1190] sm:$0xff] }
 0x449   :  { %v1240_v21 = vand.u32 2147483647, %v600_v17 }
 0x44a   :  { %v1857_v23 = vadd.f32 %v1856_v20, %v1217_v16  ;;  %v601_v20 = vld [vmem:[#allocation2 + $0x1198] sm:$0xff] }
 0x44b   :  { %v1241_v24 = vand.u32 2147483647, %v601_v20 }
 0x44c   :  { %v1858_v26 = vadd.f32 %v1857_v23, %v1218_v19  ;;  %v602_v23 = vld [vmem:[#allocation2 + $0x11a0] sm:$0xff] }
 0x44d   :  { %v1242_v27 = vand.u32 2147483647, %v602_v23 }
 0x44e   :  { %v1859_v29 = vadd.f32 %v1858_v26, %v1219_v22  ;;  %v603_v26 = vld [vmem:[#allocation2 + $0x11a8] sm:$0xff] }
 0x44f   :  { %v1243_v30 = vand.u32 2147483647, %v603_v26 }
 0x450   :  { %v1860_v32 = vadd.f32 %v1859_v29, %v1220_v25  ;;  %v604_v29 = vld [vmem:[#allocation2 + $0x11b0] sm:$0xff] }
 0x451   :  { %v1244_v33 = vand.u32 2147483647, %v604_v29 }
 0x452   :  { %v1861_v35 = vadd.f32 %v1860_v32, %v1221_v28  ;;  %v605_v32 = vld [vmem:[#allocation2 + $0x11b8] sm:$0xff] }
 0x453   :  { %v1245_v36 = vand.u32 2147483647, %v605_v32 }
 0x454   :  { %v1862_v38 = vadd.f32 %v1861_v35, %v1222_v31  ;;  %v606_v35 = vld [vmem:[#allocation2 + $0x11c0] sm:$0xff] }
 0x455   :  { %v1246_v39 = vand.u32 2147483647, %v606_v35 }
 0x456   :  { %v1863_v41 = vadd.f32 %v1862_v38, %v1223_v34  ;;  %v607_v38 = vld [vmem:[#allocation2 + $0x11c8] sm:$0xff] }
 0x457   :  { %v1247_v42 = vand.u32 2147483647, %v607_v38 }
 0x458   :  { %v1864_v44 = vadd.f32 %v1863_v41, %v1224_v37  ;;  %v608_v41 = vld [vmem:[#allocation2 + $0x11d0] sm:$0xff] }
 0x459   :  { %v1248_v45 = vand.u32 2147483647, %v608_v41 }
 0x45a   :  { %v1865_v47 = vadd.f32 %v1864_v44, %v1225_v40  ;;  %v609_v44 = vld [vmem:[#allocation2 + $0x11d8] sm:$0xff] }
 0x45b   :  { %v1249_v48 = vand.u32 2147483647, %v609_v44 }
 0x45c   :  { %v1866_v50 = vadd.f32 %v1865_v47, %v1226_v43  ;;  %v610_v47 = vld [vmem:[#allocation2 + $0x11e0] sm:$0xff] }
 0x45d   :  { %v1250_v51 = vand.u32 2147483647, %v610_v47 }
 0x45e   :  { %v1867_v53 = vadd.f32 %v1866_v50, %v1227_v46  ;;  %v611_v50 = vld [vmem:[#allocation2 + $0x11e8] sm:$0xff] }
 0x45f   :  { %v1251_v54 = vand.u32 2147483647, %v611_v50 }
 0x460   :  { %v1868_v56 = vadd.f32 %v1867_v53, %v1228_v49  ;;  %v612_v53 = vld [vmem:[#allocation2 + $0x11f0] sm:$0xff] }
 0x461   :  { %v1252_v57 = vand.u32 2147483647, %v612_v53 }
 0x462   :  { %v1869_v59 = vadd.f32 %v1868_v56, %v1229_v52  ;;  %v613_v56 = vld [vmem:[#allocation2 + $0x11f8] sm:$0xff] }
 0x463   :  { %v1253_v60 = vand.u32 2147483647, %v613_v56 }
 0x464   :  { %v1870_v62 = vadd.f32 %v1869_v59, %v1230_v55  ;;  %v614_v59 = vld [vmem:[#allocation2 + $0x1200] sm:$0xff] }
 0x465   :  { %v1254_v63 = vand.u32 2147483647, %v614_v59 }
 0x466   :  { %v1871_v1 = vadd.f32 %v1870_v62, %v1231_v58  ;;  %v615_v62 = vld [vmem:[#allocation2 + $0x1208] sm:$0xff] }
 0x467   :  { %v1255_v2 = vand.u32 2147483647, %v615_v62 }
 0x468   :  { %v1872_v4 = vadd.f32 %v1871_v1, %v1232_v61  ;;  %v616_v1 = vld [vmem:[#allocation2 + $0x1210] sm:$0xff] }
 0x469   :  { %v1256_v5 = vand.u32 2147483647, %v616_v1 }
 0x46a   :  { %v1873_v7 = vadd.f32 %v1872_v4, %v1233_v0  ;;  %v617_v4 = vld [vmem:[#allocation2 + $0x1218] sm:$0xff] }
 0x46b   :  { %v1257_v8 = vand.u32 2147483647, %v617_v4 }
 0x46c   :  { %v1874_v10 = vadd.f32 %v1873_v7, %v1234_v3  ;;  %v618_v7 = vld [vmem:[#allocation2 + $0x1220] sm:$0xff] }
 0x46d   :  { %v1258_v11 = vand.u32 2147483647, %v618_v7 }
 0x46e   :  { %v1875_v13 = vadd.f32 %v1874_v10, %v1235_v6  ;;  %v619_v10 = vld [vmem:[#allocation2 + $0x1228] sm:$0xff] }
 0x46f   :  { %v1259_v14 = vand.u32 2147483647, %v619_v10 }
 0x470   :  { %v1876_v16 = vadd.f32 %v1875_v13, %v1236_v9  ;;  %v620_v13 = vld [vmem:[#allocation2 + $0x1230] sm:$0xff] }
 0x471   :  { %v1260_v17 = vand.u32 2147483647, %v620_v13 }
 0x472   :  { %v1877_v19 = vadd.f32 %v1876_v16, %v1237_v12  ;;  %v621_v16 = vld [vmem:[#allocation2 + $0x1238] sm:$0xff] }
 0x473   :  { %v1261_v20 = vand.u32 2147483647, %v621_v16 }
 0x474   :  { %v1878_v22 = vadd.f32 %v1877_v19, %v1238_v15  ;;  %v622_v19 = vld [vmem:[#allocation2 + $0x1240] sm:$0xff] }
 0x475   :  { %v1262_v23 = vand.u32 2147483647, %v622_v19 }
 0x476   :  { %v1879_v25 = vadd.f32 %v1878_v22, %v1239_v18  ;;  %v623_v22 = vld [vmem:[#allocation2 + $0x1248] sm:$0xff] }
 0x477   :  { %v1263_v26 = vand.u32 2147483647, %v623_v22 }
 0x478   :  { %v1880_v28 = vadd.f32 %v1879_v25, %v1240_v21  ;;  %v624_v25 = vld [vmem:[#allocation2 + $0x1250] sm:$0xff] }
 0x479   :  { %v1264_v29 = vand.u32 2147483647, %v624_v25 }
 0x47a   :  { %v1881_v31 = vadd.f32 %v1880_v28, %v1241_v24  ;;  %v625_v28 = vld [vmem:[#allocation2 + $0x1258] sm:$0xff] }
 0x47b   :  { %v1265_v32 = vand.u32 2147483647, %v625_v28 }
 0x47c   :  { %v1882_v34 = vadd.f32 %v1881_v31, %v1242_v27  ;;  %v626_v31 = vld [vmem:[#allocation2 + $0x1260] sm:$0xff] }
 0x47d   :  { %v1266_v35 = vand.u32 2147483647, %v626_v31 }
 0x47e   :  { %v1883_v37 = vadd.f32 %v1882_v34, %v1243_v30  ;;  %v627_v34 = vld [vmem:[#allocation2 + $0x1268] sm:$0xff] }
 0x47f   :  { %v1267_v38 = vand.u32 2147483647, %v627_v34 }
 0x480   :  { %v1884_v40 = vadd.f32 %v1883_v37, %v1244_v33  ;;  %v628_v37 = vld [vmem:[#allocation2 + $0x1270] sm:$0xff] }
 0x481   :  { %v1268_v41 = vand.u32 2147483647, %v628_v37 }
 0x482   :  { %v1885_v43 = vadd.f32 %v1884_v40, %v1245_v36  ;;  %v629_v40 = vld [vmem:[#allocation2 + $0x1278] sm:$0xff] }
 0x483   :  { %v1269_v44 = vand.u32 2147483647, %v629_v40 }
 0x484   :  { %v1886_v46 = vadd.f32 %v1885_v43, %v1246_v39  ;;  %v630_v43 = vld [vmem:[#allocation2 + $0x1280] sm:$0xff] }
 0x485   :  { %v1270_v47 = vand.u32 2147483647, %v630_v43 }
 0x486   :  { %v1887_v49 = vadd.f32 %v1886_v46, %v1247_v42  ;;  %v631_v46 = vld [vmem:[#allocation2 + $0x1288] sm:$0xff] }
 0x487   :  { %v1271_v50 = vand.u32 2147483647, %v631_v46 }
 0x488   :  { %v1888_v52 = vadd.f32 %v1887_v49, %v1248_v45  ;;  %v632_v49 = vld [vmem:[#allocation2 + $0x1290] sm:$0xff] }
 0x489   :  { %v1272_v53 = vand.u32 2147483647, %v632_v49 }
 0x48a   :  { %v1889_v55 = vadd.f32 %v1888_v52, %v1249_v48  ;;  %v633_v52 = vld [vmem:[#allocation2 + $0x1298] sm:$0xff] }
 0x48b   :  { %v1273_v56 = vand.u32 2147483647, %v633_v52 }
 0x48c   :  { %v1890_v58 = vadd.f32 %v1889_v55, %v1250_v51  ;;  %v634_v55 = vld [vmem:[#allocation2 + $0x12a0] sm:$0xff] }
 0x48d   :  { %v1274_v59 = vand.u32 2147483647, %v634_v55 }
 0x48e   :  { %v1891_v61 = vadd.f32 %v1890_v58, %v1251_v54  ;;  %v635_v58 = vld [vmem:[#allocation2 + $0x12a8] sm:$0xff] }
 0x48f   :  { %v1275_v62 = vand.u32 2147483647, %v635_v58 }
 0x490   :  { %v1892_v0 = vadd.f32 %v1891_v61, %v1252_v57  ;;  %v636_v61 = vld [vmem:[#allocation2 + $0x12b0] sm:$0xff] }
 0x491   :  { %v1276_v1 = vand.u32 2147483647, %v636_v61 }
 0x492   :  { %v1893_v3 = vadd.f32 %v1892_v0, %v1253_v60  ;;  %v637_v0 = vld [vmem:[#allocation2 + $0x12b8] sm:$0xff] }
 0x493   :  { %v1277_v4 = vand.u32 2147483647, %v637_v0 }
 0x494   :  { %v1894_v6 = vadd.f32 %v1893_v3, %v1254_v63  ;;  %v638_v3 = vld [vmem:[#allocation2 + $0x12c0] sm:$0xff] }
 0x495   :  { %v1278_v7 = vand.u32 2147483647, %v638_v3 }
 0x496   :  { %v1895_v9 = vadd.f32 %v1894_v6, %v1255_v2  ;;  %v639_v6 = vld [vmem:[#allocation2 + $0x12c8] sm:$0xff] }
 0x497   :  { %v1279_v10 = vand.u32 2147483647, %v639_v6 }
 0x498   :  { %v1896_v12 = vadd.f32 %v1895_v9, %v1256_v5  ;;  %v640_v9 = vld [vmem:[#allocation2 + $0x12d0] sm:$0xff] }
 0x499   :  { %v1280_v13 = vand.u32 2147483647, %v640_v9 }
 0x49a   :  { %v1897_v15 = vadd.f32 %v1896_v12, %v1257_v8  ;;  %v641_v12 = vld [vmem:[#allocation2 + $0x12d8] sm:$0xff] }
 0x49b   :  { %v1281_v16 = vand.u32 2147483647, %v641_v12 }
 0x49c   :  { %v1898_v18 = vadd.f32 %v1897_v15, %v1258_v11  ;;  %v642_v15 = vld [vmem:[#allocation2 + $0x12e0] sm:$0xff] }
 0x49d   :  { %v1282_v19 = vand.u32 2147483647, %v642_v15 }
 0x49e   :  { %v1899_v21 = vadd.f32 %v1898_v18, %v1259_v14  ;;  %v643_v18 = vld [vmem:[#allocation2 + $0x12e8] sm:$0xff] }
 0x49f   :  { %v1283_v22 = vand.u32 2147483647, %v643_v18 }
 0x4a0   :  { %v1900_v24 = vadd.f32 %v1899_v21, %v1260_v17  ;;  %v644_v21 = vld [vmem:[#allocation2 + $0x12f0] sm:$0xff] }
 0x4a1   :  { %v1284_v25 = vand.u32 2147483647, %v644_v21 }
 0x4a2   :  { %v1901_v27 = vadd.f32 %v1900_v24, %v1261_v20  ;;  %v645_v24 = vld [vmem:[#allocation2 + $0x12f8] sm:$0xff] }
 0x4a3   :  { %v1285_v28 = vand.u32 2147483647, %v645_v24 }
 0x4a4   :  { %v1902_v30 = vadd.f32 %v1901_v27, %v1262_v23  ;;  %v646_v27 = vld [vmem:[#allocation2 + $0x1300] sm:$0xff] }
 0x4a5   :  { %v1286_v31 = vand.u32 2147483647, %v646_v27 }
 0x4a6   :  { %v1903_v33 = vadd.f32 %v1902_v30, %v1263_v26  ;;  %v647_v30 = vld [vmem:[#allocation2 + $0x1308] sm:$0xff] }
 0x4a7   :  { %v1287_v34 = vand.u32 2147483647, %v647_v30 }
 0x4a8   :  { %v1904_v36 = vadd.f32 %v1903_v33, %v1264_v29  ;;  %v648_v33 = vld [vmem:[#allocation2 + $0x1310] sm:$0xff] }
 0x4a9   :  { %v1288_v37 = vand.u32 2147483647, %v648_v33 }
 0x4aa   :  { %v1905_v39 = vadd.f32 %v1904_v36, %v1265_v32  ;;  %v649_v36 = vld [vmem:[#allocation2 + $0x1318] sm:$0xff] }
 0x4ab   :  { %v1289_v40 = vand.u32 2147483647, %v649_v36 }
 0x4ac   :  { %v1906_v42 = vadd.f32 %v1905_v39, %v1266_v35  ;;  %v650_v39 = vld [vmem:[#allocation2 + $0x1320] sm:$0xff] }
 0x4ad   :  { %v1290_v43 = vand.u32 2147483647, %v650_v39 }
 0x4ae   :  { %v1907_v45 = vadd.f32 %v1906_v42, %v1267_v38  ;;  %v651_v42 = vld [vmem:[#allocation2 + $0x1328] sm:$0xff] }
 0x4af   :  { %v1291_v46 = vand.u32 2147483647, %v651_v42 }
 0x4b0   :  { %v1908_v48 = vadd.f32 %v1907_v45, %v1268_v41  ;;  %v652_v45 = vld [vmem:[#allocation2 + $0x1330] sm:$0xff] }
 0x4b1   :  { %v1292_v49 = vand.u32 2147483647, %v652_v45 }
 0x4b2   :  { %v1909_v51 = vadd.f32 %v1908_v48, %v1269_v44  ;;  %v653_v48 = vld [vmem:[#allocation2 + $0x1338] sm:$0xff] }
 0x4b3   :  { %v1293_v52 = vand.u32 2147483647, %v653_v48 }
 0x4b4   :  { %v1910_v54 = vadd.f32 %v1909_v51, %v1270_v47  ;;  %v654_v51 = vld [vmem:[#allocation2 + $0x1340] sm:$0xff] }
 0x4b5   :  { %v1294_v55 = vand.u32 2147483647, %v654_v51 }
 0x4b6   :  { %v1911_v57 = vadd.f32 %v1910_v54, %v1271_v50  ;;  %v655_v54 = vld [vmem:[#allocation2 + $0x1348] sm:$0xff] }
 0x4b7   :  { %v1295_v58 = vand.u32 2147483647, %v655_v54 }
 0x4b8   :  { %v1912_v60 = vadd.f32 %v1911_v57, %v1272_v53  ;;  %v656_v57 = vld [vmem:[#allocation2 + $0x1350] sm:$0xff] }
 0x4b9   :  { %v1296_v61 = vand.u32 2147483647, %v656_v57 }
 0x4ba   :  { %v1913_v63 = vadd.f32 %v1912_v60, %v1273_v56  ;;  %v657_v60 = vld [vmem:[#allocation2 + $0x1358] sm:$0xff] }
 0x4bb   :  { %v1297_v0 = vand.u32 2147483647, %v657_v60 }
 0x4bc   :  { %v1914_v2 = vadd.f32 %v1913_v63, %v1274_v59  ;;  %v658_v63 = vld [vmem:[#allocation2 + $0x1360] sm:$0xff] }
 0x4bd   :  { %v1298_v3 = vand.u32 2147483647, %v658_v63 }
 0x4be   :  { %v1915_v5 = vadd.f32 %v1914_v2, %v1275_v62  ;;  %v659_v2 = vld [vmem:[#allocation2 + $0x1368] sm:$0xff] }
 0x4bf   :  { %v1299_v6 = vand.u32 2147483647, %v659_v2 }
 0x4c0   :  { %v1916_v8 = vadd.f32 %v1915_v5, %v1276_v1  ;;  %v660_v5 = vld [vmem:[#allocation2 + $0x1370] sm:$0xff] }
 0x4c1   :  { %v1300_v9 = vand.u32 2147483647, %v660_v5 }
 0x4c2   :  { %v1917_v11 = vadd.f32 %v1916_v8, %v1277_v4  ;;  %v661_v8 = vld [vmem:[#allocation2 + $0x1378] sm:$0xff] }
 0x4c3   :  { %v1301_v12 = vand.u32 2147483647, %v661_v8 }
 0x4c4   :  { %v1918_v14 = vadd.f32 %v1917_v11, %v1278_v7  ;;  %v662_v11 = vld [vmem:[#allocation2 + $0x1380] sm:$0xff] }
 0x4c5   :  { %v1302_v15 = vand.u32 2147483647, %v662_v11 }
 0x4c6   :  { %v1919_v17 = vadd.f32 %v1918_v14, %v1279_v10  ;;  %v663_v14 = vld [vmem:[#allocation2 + $0x1388] sm:$0xff] }
 0x4c7   :  { %v1303_v18 = vand.u32 2147483647, %v663_v14 }
 0x4c8   :  { %v1920_v20 = vadd.f32 %v1919_v17, %v1280_v13  ;;  %v664_v17 = vld [vmem:[#allocation2 + $0x1390] sm:$0xff] }
 0x4c9   :  { %v1304_v21 = vand.u32 2147483647, %v664_v17 }
 0x4ca   :  { %v1921_v23 = vadd.f32 %v1920_v20, %v1281_v16  ;;  %v665_v20 = vld [vmem:[#allocation2 + $0x1398] sm:$0xff] }
 0x4cb   :  { %v1305_v24 = vand.u32 2147483647, %v665_v20 }
 0x4cc   :  { %v1922_v26 = vadd.f32 %v1921_v23, %v1282_v19  ;;  %v666_v23 = vld [vmem:[#allocation2 + $0x13a0] sm:$0xff] }
 0x4cd   :  { %v1306_v27 = vand.u32 2147483647, %v666_v23 }
 0x4ce   :  { %v1923_v29 = vadd.f32 %v1922_v26, %v1283_v22  ;;  %v667_v26 = vld [vmem:[#allocation2 + $0x13a8] sm:$0xff] }
 0x4cf   :  { %v1307_v30 = vand.u32 2147483647, %v667_v26 }
 0x4d0   :  { %v1924_v32 = vadd.f32 %v1923_v29, %v1284_v25  ;;  %v668_v29 = vld [vmem:[#allocation2 + $0x13b0] sm:$0xff] }
 0x4d1   :  { %v1308_v33 = vand.u32 2147483647, %v668_v29 }
 0x4d2   :  { %v1925_v35 = vadd.f32 %v1924_v32, %v1285_v28  ;;  %v669_v32 = vld [vmem:[#allocation2 + $0x13b8] sm:$0xff] }
 0x4d3   :  { %v1309_v36 = vand.u32 2147483647, %v669_v32 }
 0x4d4   :  { %v1926_v38 = vadd.f32 %v1925_v35, %v1286_v31  ;;  %v670_v35 = vld [vmem:[#allocation2 + $0x13c0] sm:$0xff] }
 0x4d5   :  { %v1310_v39 = vand.u32 2147483647, %v670_v35 }
 0x4d6   :  { %v1927_v41 = vadd.f32 %v1926_v38, %v1287_v34  ;;  %v671_v38 = vld [vmem:[#allocation2 + $0x13c8] sm:$0xff] }
 0x4d7   :  { %v1311_v42 = vand.u32 2147483647, %v671_v38 }
 0x4d8   :  { %v1928_v44 = vadd.f32 %v1927_v41, %v1288_v37  ;;  %v672_v41 = vld [vmem:[#allocation2 + $0x13d0] sm:$0xff] }
 0x4d9   :  { %v1312_v45 = vand.u32 2147483647, %v672_v41 }
 0x4da   :  { %v1929_v47 = vadd.f32 %v1928_v44, %v1289_v40  ;;  %v673_v44 = vld [vmem:[#allocation2 + $0x13d8] sm:$0xff] }
 0x4db   :  { %v1313_v48 = vand.u32 2147483647, %v673_v44 }
 0x4dc   :  { %v1930_v50 = vadd.f32 %v1929_v47, %v1290_v43  ;;  %v674_v47 = vld [vmem:[#allocation2 + $0x13e0] sm:$0xff] }
 0x4dd   :  { %v1314_v51 = vand.u32 2147483647, %v674_v47 }
 0x4de   :  { %v1931_v53 = vadd.f32 %v1930_v50, %v1291_v46  ;;  %v675_v50 = vld [vmem:[#allocation2 + $0x13e8] sm:$0xff] }
 0x4df   :  { %v1315_v54 = vand.u32 2147483647, %v675_v50 }
 0x4e0   :  { %v1932_v56 = vadd.f32 %v1931_v53, %v1292_v49  ;;  %v676_v53 = vld [vmem:[#allocation2 + $0x13f0] sm:$0xff] }
 0x4e1   :  { %v1316_v57 = vand.u32 2147483647, %v676_v53 }
 0x4e2   :  { %v1933_v59 = vadd.f32 %v1932_v56, %v1293_v52  ;;  %v677_v56 = vld [vmem:[#allocation2 + $0x13f8] sm:$0xff] }
 0x4e4   :  { %v1934_v62 = vadd.f32 %v1933_v59, %v1294_v55  ;;  %v1317_v59 = vand.u32 2147483647, %v677_v56 }
 0x4e6   :  { %v1935_v1 = vadd.f32 %v1934_v62, %v1295_v58 }
 0x4e8   :  { %v1936_v4 = vadd.f32 %v1935_v1, %v1296_v61 }
 0x4ea   :  { %v1937_v7 = vadd.f32 %v1936_v4, %v1297_v0 }
 0x4ec   :  { %v1938_v10 = vadd.f32 %v1937_v7, %v1298_v3 }
 0x4ee   :  { %v1939_v13 = vadd.f32 %v1938_v10, %v1299_v6 }
 0x4f0   :  { %v1940_v16 = vadd.f32 %v1939_v13, %v1300_v9 }
 0x4f2   :  { %v1941_v19 = vadd.f32 %v1940_v16, %v1301_v12 }
 0x4f4   :  { %v1942_v22 = vadd.f32 %v1941_v19, %v1302_v15 }
 0x4f6   :  { %v1943_v25 = vadd.f32 %v1942_v22, %v1303_v18 }
 0x4f8   :  { %v1944_v28 = vadd.f32 %v1943_v25, %v1304_v21 }
 0x4fa   :  { %v1945_v31 = vadd.f32 %v1944_v28, %v1305_v24 }
 0x4fc   :  { %v1946_v34 = vadd.f32 %v1945_v31, %v1306_v27 }
 0x4fe   :  { %v1947_v37 = vadd.f32 %v1946_v34, %v1307_v30 }
 0x500   :  { %v1948_v40 = vadd.f32 %v1947_v37, %v1308_v33 }
 0x502   :  { %v1949_v43 = vadd.f32 %v1948_v40, %v1309_v36 }
 0x504   :  { %v1950_v46 = vadd.f32 %v1949_v43, %v1310_v39 }
 0x506   :  { %v1951_v49 = vadd.f32 %v1950_v46, %v1311_v42 }
 0x508   :  { %v1952_v52 = vadd.f32 %v1951_v49, %v1312_v45 }
 0x50a   :  { %v1953_v55 = vadd.f32 %v1952_v52, %v1313_v48 }
 0x50c   :  { %v1954_v58 = vadd.f32 %v1953_v55, %v1314_v51 }
 0x50e   :  { %v1955_v60 = vadd.f32 %v1954_v58, %v1315_v54 }
 0x510   :  { %v1956_v61 = vadd.f32 %v1955_v60, %v1316_v57 }
 0x512   :  { %v1957_v62 = vadd.f32 %v1956_v61, %v1317_v59 }
 0x514   :  { %1959 = vst [vmem:[#allocation5] sm:$0xff] %v1957_v62 }
 0x515   :  { %2015 = shalt.err (!%p2012_p12)
}
 0x516   :  { %s2016_s24 = scalar_lea.hbm %s2069_s1, 128 }
 0x517   :  { %p2017_p13 = scmp.ne.s32.totalorder %s2069_s1, %s2016_s24  ;;  %p2020_p0 = scmp.lt.u32.totalorder %s2016_s24, %s2069_s1 }
 0x519   :  { %p2022_p1 = pnand %p2020_p0, %p2017_p13 }
 0x51b   :  { %2025 = shalt.err (!%p2022_p1)
}
 0x51c   :  { %1969 = dma.vmem_to_hbm [thread:$0]  %s1967_s20, 128, %s2069_s1, [#allocation4]  }
 0x51d   :  { %2028 = dma.done.wait [#allocation4], 128  }
 0x51e   :  { %2029 = vsyncadd [#allocation4], 4294967168 }
 0x51f   :  { %1973 = vsyncpa [#allocation3], 1 }
 0x520   :  { %1974 = vsyncpa [#allocation4], 1 }

</bundles_post_ra>
